<compile_context>
chip_gen: v5e
topology: v5e:2x2
jax: 0.10.0
libtpu: 0.0.40
codegen_flags: <defaults>
</compile_context>

<pallas_src>
import functools

import jax
import jax.numpy as jnp
from jax import lax
from jax.experimental import pallas as pl
from jax.experimental.pallas import tpu as pltpu

EPS = 1e-5  # nn.InstanceNorm2d default


def _round_up(v, m):
    return ((v + m - 1) // m) * m


def _pick_strip_rows(H, W, max_rows):
    """Largest SH <= max_rows with H % SH == 0 and lane-dense blocks."""
    for sh in range(min(H, max_rows), 0, -1):
        if H % sh == 0 and (sh * W) % 128 == 0:
            return sh
    return H  # single strip: block == full dims, always legal


# ---------------------------------------------------------------------------
# Fused strip kernel: mlp_shared conv + gamma/beta convs + norm apply/combine
# ---------------------------------------------------------------------------
def _spade_strip_kernel(x_ref, mean_ref, inv_ref, seg_ref, w1_ref, b1_ref,
                        wgb_ref, bgb_ref, out_ref, actv_ref, *, W, SH, B2):
    # x_ref:    (1, C, PIX)           f32, strip of the input (channel-major)
    # mean_ref: (1, C, 1)             f32, per-image instance-norm mean
    # inv_ref:  (1, C, 1)             f32, per-image rsqrt(var + eps)
    # seg_ref:  (1, 1, (SH+4)*W, 3L)  bf16, haloed seg strip, kx-taps on lanes
    # w1_ref:   (3, 3L, NH)           bf16, mlp_shared weights grouped by ky
    # b1_ref:   (1, NH)               f32
    # wgb_ref:  (3, 2C, 3NH)          bf16, [gamma|beta] weights grouped by kx
    # bgb_ref:  (2C, 1)               f32
    # out_ref:  (1, C, PIX)           f32
    # actv_ref: (SR, NH)              bf16 scratch, actv rows at [B2, B2+Q)
    C = out_ref.shape[1]
    PIX = out_ref.shape[2]            # SH * W
    NH = w1_ref.shape[-1]
    TWO_C = wgb_ref.shape[1]
    Q = (SH + 2) * W                  # actv rows held (1 halo row each side)
    SR = actv_ref.shape[0]

    s = pl.program_id(1)

    # ---- mlp_shared: 3 matmuls (K = 3L) over ky row-windows of the strip ---
    actv = jnp.dot(seg_ref[0, 0, pl.ds(0, Q), :], w1_ref[0],
                   preferred_element_type=jnp.float32)
    for ky in range(1, 3):
        actv = actv + jnp.dot(seg_ref[0, 0, pl.ds(ky * W, Q), :], w1_ref[ky],
                              preferred_element_type=jnp.float32)
    actv = jnp.maximum(actv + b1_ref[...], 0.0)               # (Q, NH) f32

    # ---- stage actv into the padded-row scratch (bf16) ----
    # Tiny margins are re-zeroed every iteration (megacore-safe: each core has
    # its own scratch and there is no cross-iteration state to rely on).
    actv_ref[pl.ds(0, B2), :] = jnp.zeros((B2, NH), jnp.bfloat16)
    actv_ref[pl.ds(B2 + Q, SR - B2 - Q), :] = jnp.zeros(
        (SR - B2 - Q, NH), jnp.bfloat16)
    actv_ref[pl.ds(B2, Q), :] = actv.astype(jnp.bfloat16)

    # Halo rows that fall outside the image must be zero (SAME padding of the
    # gamma/beta conv pads *actv*, not conv-of-padded-segmap).
    @pl.when(s == 0)
    def _():
        actv_ref[pl.ds(B2, W), :] = jnp.zeros((W, NH), jnp.bfloat16)

    @pl.when(s == pl.num_programs(1) - 1)
    def _():
        actv_ref[pl.ds(B2 + (SH + 1) * W, W), :] = jnp.zeros(
            (W, NH), jnp.bfloat16)

    # ---- gamma|beta conv: 3 merged-ky matmuls (K = 3*NH) ----
    # Compact-width storage wraps w=-1 / w=W reads onto neighbouring rows;
    # two cheap lane masks restore the zero padding.
    col = lax.broadcasted_iota(jnp.int32, (1, PIX), 1) % W
    not_left = col != 0
    not_right = col != (W - 1)

    gb = jnp.broadcast_to(bgb_ref[...], (TWO_C, PIX)).astype(jnp.float32)
    for kx in range(3):
        win3 = jnp.concatenate(
            [actv_ref[pl.ds(B2 + ky * W + kx - 1, PIX), :] for ky in range(3)],
            axis=1)                                           # (PIX, 3NH) bf16
        grp = lax.dot_general(
            wgb_ref[kx], win3,
            dimension_numbers=(((1,), (1,)), ((), ())),
            preferred_element_type=jnp.float32)               # (2C, PIX) f32
        if kx == 0:
            grp = jnp.where(not_left, grp, 0.0)
        elif kx == 2:
            grp = jnp.where(not_right, grp, 0.0)
        gb = gb + grp

    gamma = gb[:C, :]
    beta = gb[C:, :]

    # ---- instance-norm apply + SPADE combine (stats precomputed per image) --
    x = x_ref[0].astype(jnp.float32)                          # (C, PIX)
    xn = (x - mean_ref[0]) * inv_ref[0]
    out_ref[0] = (xn * (1.0 + gamma) + beta).astype(out_ref.dtype)


# ---------------------------------------------------------------------------
# Wrapper (NCHW in / NCHW out, like the PyTorch module)
# ---------------------------------------------------------------------------
@functools.partial(jax.jit, static_argnames=("max_strip_rows",))
def spade_forward(x_nchw, segmap_nchw, params, max_strip_rows=64):
    N, C, H, W = x_nchw.shape
    L = segmap_nchw.shape[1]
    NH = params["b1"].shape[-1]
    HW = H * W

    SH = _pick_strip_rows(H, W, max_strip_rows)
    S = H // SH
    PIX = SH * W

    # --- instance-norm statistics: full-image reduction (pre-pass) ---
    # TODO(synk): fold this reduction into a tiny Pallas stats pre-pass kernel
    # to avoid the extra XLA pass over x; strips cannot compute it locally.
    x_flat = x_nchw.reshape(N, C, HW).astype(jnp.float32)
    mean = jnp.mean(x_flat, axis=-1, keepdims=True)                 # (N, C, 1)
    var = jnp.mean(jnp.square(x_flat - mean), axis=-1, keepdims=True)
    inv_std = lax.rsqrt(var + EPS)                                  # (N, C, 1)

    # --- nearest resize + kx-tap prebake + 2-row zero pad + haloed strips ---
    Hs, Ws = segmap_nchw.shape[2], segmap_nchw.shape[3]
    hi = (jnp.arange(H) * Hs) // H                  # PyTorch 'nearest'
    wi = (jnp.arange(W) * Ws) // W
    seg_r = segmap_nchw.astype(jnp.float32)[:, :, hi, :][:, :, :, wi]
    seg_r = jnp.transpose(seg_r, (0, 2, 3, 1))                      # (N,H,W,L)
    zc = jnp.zeros((N, H, 1, L), jnp.float32)
    seg3 = jnp.concatenate(
        [jnp.concatenate([zc, seg_r[:, :, :-1, :]], axis=2),        # kx=0: w-1
         seg_r,                                                     # kx=1: w
         jnp.concatenate([seg_r[:, :, 1:, :], zc], axis=2)],        # kx=2: w+1
        axis=3)                                                     # (N,H,W,3L)
    seg3 = jnp.pad(seg3, ((0, 0), (2, 2), (0, 0), (0, 0)))          # (N,H+4,W,3L)
    seg_strips = jnp.stack(
        [seg3[:, s * SH:s * SH + SH + 4] for s in range(S)], axis=1)
    seg_strips = seg_strips.reshape(
        N, S, (SH + 4) * W, 3 * L).astype(jnp.bfloat16)

    # --- weights: ky-grouped mlp taps, kx-grouped [gamma|beta] taps (bf16) ---
    w1 = params["w1"]                                               # (9, L, NH)
    w1ky = jnp.stack(
        [jnp.concatenate([w1[ky * 3 + kx] for kx in range(3)], axis=0)
         for ky in range(3)], axis=0).astype(jnp.bfloat16)          # (3,3L,NH)
    wtap = jnp.transpose(
        jnp.concatenate([params["wg"], params["wb"]], axis=-1),
        (0, 2, 1))                                                  # (9,2C,NH)
    wgb3 = jnp.stack(
        [jnp.concatenate([wtap[ky * 3 + kx] for ky in range(3)], axis=-1)
         for kx in range(3)], axis=0).astype(jnp.bfloat16)          # (3,2C,3NH)
    b1 = params["b1"].reshape(1, NH).astype(jnp.float32)
    bgb = jnp.concatenate([params["bg"], params["bb"]],
                          axis=-1).reshape(2 * C, 1).astype(jnp.float32)

    # --- scratch layout: actv rows live at [B2, B2 + (SH+2)*W) ---
    B2 = 8
    Q = (SH + 2) * W
    SR = _round_up(B2 + Q + 8, 8)

    kernel = functools.partial(_spade_strip_kernel, W=W, SH=SH, B2=B2)

    flops = N * S * (2 * Q * (3 * L) * NH * 3
                     + 2 * (2 * C) * (3 * NH) * PIX * 3)
    bytes_accessed = (2 * N * C * HW * 4                     # x in + out
                      + N * S * (SH + 4) * W * 3 * L * 2     # seg strips bf16
                      + 2 * N * C * 4                        # stats
                      + (9 * L * NH + 9 * 2 * C * NH) * 2)   # weights bf16
    cost = pl.CostEstimate(flops=flops, transcendentals=0,
                           bytes_accessed=bytes_accessed)

    out_flat = pl.pallas_call(
        kernel,
        out_shape=jax.ShapeDtypeStruct((N, C, HW), jnp.float32),
        grid_spec=pltpu.PrefetchScalarGridSpec(
            num_scalar_prefetch=0,
            grid=(N, S),
            in_specs=[
                pl.BlockSpec((1, C, PIX), lambda n, s: (n, 0, s)),
                pl.BlockSpec((1, C, 1), lambda n, s: (n, 0, 0)),
                pl.BlockSpec((1, C, 1), lambda n, s: (n, 0, 0)),
                pl.BlockSpec((1, 1, (SH + 4) * W, 3 * L),
                             lambda n, s: (n, s, 0, 0)),
                pl.BlockSpec((3, 3 * L, NH), lambda n, s: (0, 0, 0)),
                pl.BlockSpec((1, NH), lambda n, s: (0, 0)),
                pl.BlockSpec((3, 2 * C, 3 * NH), lambda n, s: (0, 0, 0)),
                pl.BlockSpec((2 * C, 1), lambda n, s: (0, 0)),
            ],
            out_specs=pl.BlockSpec((1, C, PIX), lambda n, s: (n, 0, s)),
            scratch_shapes=[pltpu.VMEM((SR, NH), jnp.bfloat16)],
        ),
        compiler_params=pltpu.CompilerParams(
            dimension_semantics=("parallel", "parallel"),
            vmem_limit_bytes=32 * 1024 * 1024),
        cost_estimate=cost,
    )(x_flat, mean, inv_std, seg_strips, w1ky, b1, wgb3, bgb)

    return out_flat.reshape(N, C, H, W)


# ---------------------------------------------------------------------------
# Pure-JAX f32 reference (independent path, for the correctness check)
# ---------------------------------------------------------------------------
def spade_reference(x_nchw, segmap_nchw, params, NH):
    N, C, H, W = x_nchw.shape
    L = segmap_nchw.shape[1]
    Hin, Win = segmap_nchw.shape[2], segmap_nchw.shape[3]
    hi = (jnp.arange(H) * Hin) // H
    wi = (jnp.arange(W) * Win) // W
    seg = segmap_nchw[:, :, hi, :][:, :, :, wi]
    seg = jnp.transpose(seg, (0, 2, 3, 1)).astype(jnp.float32)
    x = jnp.transpose(x_nchw, (0, 2, 3, 1)).astype(jnp.float32)

    mean = jnp.mean(x, axis=(1, 2), keepdims=True)
    var = jnp.mean(jnp.square(x - mean), axis=(1, 2), keepdims=True)
    normalized = (x - mean) * lax.rsqrt(var + EPS)

    dn = ("NHWC", "HWIO", "NHWC")

    def conv(inp, w_flat, b, cin, cout):
        w = w_flat.reshape(3, 3, cin, cout)
        y = lax.conv_general_dilated(inp, w, (1, 1), "SAME",
                                     dimension_numbers=dn)
        return y + b.reshape(1, 1, 1, cout)

    actv = jnp.maximum(conv(seg, params["w1"], params["b1"], L, NH), 0.0)
    gamma = conv(actv, params["wg"], params["bg"], NH, C)
    beta = conv(actv, params["wb"], params["bb"], NH, C)
    out = normalized * (1 + gamma) + beta
    return jnp.transpose(out, (0, 3, 1, 2))


# ---------------------------------------------------------------------------
if __name__ == "__main__":
    # SPADE('spadeinstance3x3', norm_nc=4, label_nc=3), nhidden=128
    N, C, H, W = 2, 4, 16, 16     # x
    L, Hs, Ws = 3, 8, 8           # segmap (smaller -> exercises interpolate)
    NH = 128                      # nhidden

    key = jax.random.PRNGKey(0)
    k = jax.random.split(key, 8)
    x = jax.random.normal(k[0], (N, C, H, W), jnp.float32)
    segmap = jax.random.normal(k[1], (N, L, Hs, Ws), jnp.float32)

    params = {
        # conv weights stored tap-major (9, Cin, Cout); biases (1, Cout)
        "w1": 0.1 * jax.random.normal(k[2], (9, L, NH), jnp.float32),
        "b1": 0.1 * jax.random.normal(k[3], (1, NH), jnp.float32),
        "wg": 0.1 * jax.random.normal(k[4], (9, NH, C), jnp.float32),
        "bg": 0.1 * jax.random.normal(k[5], (1, C), jnp.float32),
        "wb": 0.1 * jax.random.normal(k[6], (9, NH, C), jnp.float32),
        "bb": 0.1 * jax.random.normal(k[7], (1, C), jnp.float32),
    }

    # max_strip_rows=8 -> 2 strips of 8 rows: exercises halos + strip tiling.
    out = spade_forward(x, segmap, params, max_strip_rows=8)
    out = jax.block_until_ready(out)

    ref = spade_reference(x, segmap, params, NH)
    assert out.shape == (N, C, H, W)

    # bf16 weights/activations with f32 accumulation: elementwise tolerance is
    # a few 1e-2 worst-case; relative Frobenius error should be ~1e-3.
    assert jnp.allclose(out, ref, atol=5e-2, rtol=5e-2), "mismatch vs reference"
    rel = jnp.linalg.norm(out - ref) / jnp.linalg.norm(ref)
    assert rel < 1e-2, f"relative error too large: {rel}"

    print("KERNEL_OK")
</pallas_src>

<mosaic_0001>
module attributes {stable_mosaic.version = 11 : i64} {
  func.func @_spade_strip_kernel(%arg0: i32, %arg1: i32, %arg2: memref<1x4x128xf32, #tpu.memory_space<vmem>>, %arg3: memref<1x4x1xf32, #tpu.memory_space<vmem>>, %arg4: memref<1x4x1xf32, #tpu.memory_space<vmem>>, %arg5: memref<1x1x192x9xbf16, #tpu.memory_space<vmem>>, %arg6: memref<3x9x128xbf16, #tpu.memory_space<vmem>>, %arg7: memref<1x128xf32, #tpu.memory_space<vmem>>, %arg8: memref<3x8x384xbf16, #tpu.memory_space<vmem>>, %arg9: memref<8x1xf32, #tpu.memory_space<vmem>>, %arg10: memref<1x4x128xf32, #tpu.memory_space<vmem>>, %arg11: memref<176x128xbf16, #tpu.memory_space<vmem>>) attributes {dimension_semantics = [#tpu.dimension_semantics<parallel>, #tpu.dimension_semantics<parallel>], iteration_bounds = array<i64: 2, 2>, scalar_prefetch = 0 : i64, scratch_operands = 1 : i64, tpu.core_type = #tpu.core_type<tc>, window_params = [{transform_indices = @transform_0, window_bounds = array<i64: 1, 4, 128>}, {transform_indices = @transform_1, window_bounds = array<i64: 1, 4, 1>}, {transform_indices = @transform_2, window_bounds = array<i64: 1, 4, 1>}, {transform_indices = @transform_3, window_bounds = array<i64: 1, 1, 192, 9>}, {pipeline_mode = #tpu.pipeline_mode<synchronous>, transform_indices = @transform_4, window_bounds = array<i64: 3, 9, 128>}, {pipeline_mode = #tpu.pipeline_mode<synchronous>, transform_indices = @transform_5, window_bounds = array<i64: 1, 128>}, {pipeline_mode = #tpu.pipeline_mode<synchronous>, transform_indices = @transform_6, window_bounds = array<i64: 3, 8, 384>}, {pipeline_mode = #tpu.pipeline_mode<synchronous>, transform_indices = @transform_7, window_bounds = array<i64: 8, 1>}, {transform_indices = @transform_8, window_bounds = array<i64: 1, 4, 128>}]} {
    %c0 = arith.constant 0 : index
    %c0_0 = arith.constant 0 : index
    %c0_1 = arith.constant 0 : index
    %c0_2 = arith.constant 0 : index
    %0 = vector.load %arg5[%c0, %c0_0, %c0_1, %c0_2] : memref<1x1x192x9xbf16, #tpu.memory_space<vmem>>, vector<1x1x160x9xbf16>
    %1 = vector.shape_cast %0 : vector<1x1x160x9xbf16> to vector<160x9xbf16>
    %c0_3 = arith.constant 0 : index
    %c0_4 = arith.constant 0 : index
    %c0_5 = arith.constant 0 : index
    %2 = vector.load %arg6[%c0_3, %c0_4, %c0_5] : memref<3x9x128xbf16, #tpu.memory_space<vmem>>, vector<1x9x128xbf16>
    %3 = vector.shape_cast %2 : vector<1x9x128xbf16> to vector<9x128xbf16>
    %cst = arith.constant dense<0.000000e+00> : vector<160x128xf32>
    %4 = tpu.matmul %1, %3, %cst {dimension_numbers = #tpu.dot_dimension_numbers<[1], [0], [0], [1], [0, 0, 1, 1], [], []>} : vector<160x9xbf16>, vector<9x128xbf16>, vector<160x128xf32> -> vector<160x128xf32>
    %c0_6 = arith.constant 0 : index
    %c0_7 = arith.constant 0 : index
    %c16 = arith.constant 16 : index
    %c0_8 = arith.constant 0 : index
    %5 = vector.load %arg5[%c0_6, %c0_7, %c16, %c0_8] : memref<1x1x192x9xbf16, #tpu.memory_space<vmem>>, vector<1x1x160x9xbf16>
    %6 = vector.shape_cast %5 : vector<1x1x160x9xbf16> to vector<160x9xbf16>
    %c1 = arith.constant 1 : index
    %c0_9 = arith.constant 0 : index
    %c0_10 = arith.constant 0 : index
    %7 = vector.load %arg6[%c1, %c0_9, %c0_10] : memref<3x9x128xbf16, #tpu.memory_space<vmem>>, vector<1x9x128xbf16>
    %8 = vector.shape_cast %7 : vector<1x9x128xbf16> to vector<9x128xbf16>
    %cst_11 = arith.constant dense<0.000000e+00> : vector<160x128xf32>
    %9 = tpu.matmul %6, %8, %cst_11 {dimension_numbers = #tpu.dot_dimension_numbers<[1], [0], [0], [1], [0, 0, 1, 1], [], []>} : vector<160x9xbf16>, vector<9x128xbf16>, vector<160x128xf32> -> vector<160x128xf32>
    %10 = arith.addf %4, %9 : vector<160x128xf32>
    %c0_12 = arith.constant 0 : index
    %c0_13 = arith.constant 0 : index
    %c32 = arith.constant 32 : index
    %c0_14 = arith.constant 0 : index
    %11 = vector.load %arg5[%c0_12, %c0_13, %c32, %c0_14] : memref<1x1x192x9xbf16, #tpu.memory_space<vmem>>, vector<1x1x160x9xbf16>
    %12 = vector.shape_cast %11 : vector<1x1x160x9xbf16> to vector<160x9xbf16>
    %c2 = arith.constant 2 : index
    %c0_15 = arith.constant 0 : index
    %c0_16 = arith.constant 0 : index
    %13 = vector.load %arg6[%c2, %c0_15, %c0_16] : memref<3x9x128xbf16, #tpu.memory_space<vmem>>, vector<1x9x128xbf16>
    %14 = vector.shape_cast %13 : vector<1x9x128xbf16> to vector<9x128xbf16>
    %cst_17 = arith.constant dense<0.000000e+00> : vector<160x128xf32>
    %15 = tpu.matmul %12, %14, %cst_17 {dimension_numbers = #tpu.dot_dimension_numbers<[1], [0], [0], [1], [0, 0, 1, 1], [], []>} : vector<160x9xbf16>, vector<9x128xbf16>, vector<160x128xf32> -> vector<160x128xf32>
    %16 = arith.addf %10, %15 : vector<160x128xf32>
    %c0_18 = arith.constant 0 : index
    %c0_19 = arith.constant 0 : index
    %17 = vector.load %arg7[%c0_18, %c0_19] : memref<1x128xf32, #tpu.memory_space<vmem>>, vector<1x128xf32>
    %18 = vector.broadcast %17 : vector<1x128xf32> to vector<160x128xf32>
    %19 = arith.addf %16, %18 : vector<160x128xf32>
    %cst_20 = arith.constant 0.000000e+00 : f32
    %20 = vector.broadcast %cst_20 : f32 to vector<160x128xf32>
    %21 = arith.maximumf %19, %20 : vector<160x128xf32>
    %cst_21 = arith.constant 0.000000e+00 : bf16
    %22 = vector.broadcast %cst_21 : bf16 to vector<8x128xbf16>
    %c0_22 = arith.constant 0 : index
    %c0_23 = arith.constant 0 : index
    %23 = vector.load %arg11[%c0_22, %c0_23] : memref<176x128xbf16, #tpu.memory_space<vmem>>, vector<8x128xbf16>
    tpu.vector_store %arg11[%c0_22, %c0_23], %22 {strides = array<i32>} : memref<176x128xbf16, #tpu.memory_space<vmem>>, vector<8x128xbf16>,
    %cst_24 = arith.constant 0.000000e+00 : bf16
    %24 = vector.broadcast %cst_24 : bf16 to vector<8x128xbf16>
    %c168 = arith.constant 168 : index
    %c0_25 = arith.constant 0 : index
    %25 = vector.load %arg11[%c168, %c0_25] : memref<176x128xbf16, #tpu.memory_space<vmem>>, vector<8x128xbf16>
    tpu.vector_store %arg11[%c168, %c0_25], %24 {strides = array<i32>} : memref<176x128xbf16, #tpu.memory_space<vmem>>, vector<8x128xbf16>,
    %26 = arith.truncf %21 : vector<160x128xf32> to vector<160x128xbf16>
    %c8 = arith.constant 8 : index
    %c0_26 = arith.constant 0 : index
    %27 = vector.load %arg11[%c8, %c0_26] : memref<176x128xbf16, #tpu.memory_space<vmem>>, vector<160x128xbf16>
    tpu.vector_store %arg11[%c8, %c0_26], %26 {strides = array<i32>} : memref<176x128xbf16, #tpu.memory_space<vmem>>, vector<160x128xbf16>,
    %c0_i32 = arith.constant 0 : i32
    %28 = arith.cmpi eq, %arg1, %c0_i32 : i32
    %29 = arith.extui %28 : i1 to i32
    %c0_i32_27 = arith.constant 0 : i32
    %30 = arith.cmpi ne, %29, %c0_i32_27 : i32
    scf.if %30 {
      %cst_74 = arith.constant 0.000000e+00 : bf16
      %109 = vector.broadcast %cst_74 : bf16 to vector<16x128xbf16>
      %c8_75 = arith.constant 8 : index
      %c0_76 = arith.constant 0 : index
      %110 = vector.load %arg11[%c8_75, %c0_76] : memref<176x128xbf16, #tpu.memory_space<vmem>>, vector<16x128xbf16>
      tpu.vector_store %arg11[%c8_75, %c0_76], %109 {strides = array<i32>} : memref<176x128xbf16, #tpu.memory_space<vmem>>, vector<16x128xbf16>,
    } else {
    }
    %c1_i32 = arith.constant 1 : i32
    %31 = arith.cmpi eq, %arg1, %c1_i32 : i32
    %32 = arith.extui %31 : i1 to i32
    %c0_i32_28 = arith.constant 0 : i32
    %33 = arith.cmpi ne, %32, %c0_i32_28 : i32
    scf.if %33 {
      %cst_74 = arith.constant 0.000000e+00 : bf16
      %109 = vector.broadcast %cst_74 : bf16 to vector<16x128xbf16>
      %c152 = arith.constant 152 : index
      %c0_75 = arith.constant 0 : index
      %110 = vector.load %arg11[%c152, %c0_75] : memref<176x128xbf16, #tpu.memory_space<vmem>>, vector<16x128xbf16>
      tpu.vector_store %arg11[%c152, %c0_75], %109 {strides = array<i32>} : memref<176x128xbf16, #tpu.memory_space<vmem>>, vector<16x128xbf16>,
    } else {
    }
    %34 = tpu.iota {dimensions = array<i32: 1>} : vector<1x128xi32>
    %c16_i32 = arith.constant 16 : i32
    %c0_i32_29 = arith.constant 0 : i32
    %35 = arith.cmpi eq, %c16_i32, %c0_i32_29 : i32
    %c1_i32_30 = arith.constant 1 : i32
    %36 = arith.select %35, %c1_i32_30, %c16_i32 : i32
    %37 = vector.broadcast %36 : i32 to vector<1x128xi32>
    %38 = arith.remsi %34, %37 : vector<1x128xi32>
    %c0_i32_31 = arith.constant 0 : i32
    %39 = vector.broadcast %c0_i32_31 : i32 to vector<1x128xi32>
    %40 = arith.cmpi ne, %38, %39 : vector<1x128xi32>
    %c0_i32_32 = arith.constant 0 : i32
    %41 = vector.broadcast %c0_i32_32 : i32 to vector<1x128xi32>
    %42 = arith.cmpi slt, %38, %41 : vector<1x128xi32>
    %c0_i32_33 = arith.constant 0 : i32
    %43 = arith.cmpi slt, %36, %c0_i32_33 : i32
    %44 = vector.broadcast %43 : i1 to vector<1x128xi1>
    %45 = vector.broadcast %44 : vector<1x128xi1> to vector<1x128xi1>
    %46 = arith.xori %42, %45 : vector<1x128xi1>
    %47 = arith.andi %46, %40 : vector<1x128xi1>
    %48 = vector.broadcast %36 : i32 to vector<1x128xi32>
    %49 = arith.addi %38, %48 : vector<1x128xi32>
    %50 = arith.select %47, %49, %38 : vector<1x128xi1>, vector<1x128xi32>
    %c0_i32_34 = arith.constant 0 : i32
    %51 = vector.broadcast %c0_i32_34 : i32 to vector<1x128xi32>
    %52 = arith.cmpi ne, %50, %51 : vector<1x128xi32>
    %c15_i32 = arith.constant 15 : i32
    %53 = vector.broadcast %c15_i32 : i32 to vector<1x128xi32>
    %54 = arith.cmpi ne, %50, %53 : vector<1x128xi32>
    %c0_35 = arith.constant 0 : index
    %c0_36 = arith.constant 0 : index
    %55 = vector.load %arg9[%c0_35, %c0_36] : memref<8x1xf32, #tpu.memory_space<vmem>>, vector<8x1xf32>
    %56 = vector.shape_cast %55 : vector<8x1xf32> to vector<8x1xf32>
    %57 = vector.broadcast %56 : vector<8x1xf32> to vector<8x128xf32>
    %c7 = arith.constant 7 : index
    %c0_37 = arith.constant 0 : index
    %58 = vector.load %arg11[%c7, %c0_37] : memref<176x128xbf16, #tpu.memory_space<vmem>>, vector<128x128xbf16>
    %c23 = arith.constant 23 : index
    %c0_38 = arith.constant 0 : index
    %59 = vector.load %arg11[%c23, %c0_38] : memref<176x128xbf16, #tpu.memory_space<vmem>>, vector<128x128xbf16>
    %c39 = arith.constant 39 : index
    %c0_39 = arith.constant 0 : index
    %60 = vector.load %arg11[%c39, %c0_39] : memref<176x128xbf16, #tpu.memory_space<vmem>>, vector<128x128xbf16>
    %61 = tpu.concatenate %58, %59, %60 in 1 : vector<128x128xbf16>, vector<128x128xbf16>, vector<128x128xbf16> -> vector<128x384xbf16>
    %c0_40 = arith.constant 0 : index
    %c0_41 = arith.constant 0 : index
    %c0_42 = arith.constant 0 : index
    %62 = vector.load %arg8[%c0_40, %c0_41, %c0_42] : memref<3x8x384xbf16, #tpu.memory_space<vmem>>, vector<1x8x384xbf16>
    %63 = vector.shape_cast %62 : vector<1x8x384xbf16> to vector<8x384xbf16>
    %cst_43 = arith.constant dense<0.000000e+00> : vector<8x128xf32>
    %64 = tpu.matmul %63, %61, %cst_43 {dimension_numbers = #tpu.dot_dimension_numbers<[1], [1], [0], [0], [0, 0, 1, 0], [], []>} : vector<8x384xbf16>, vector<128x384xbf16>, vector<8x128xf32> -> vector<8x128xf32>
    %cst_44 = arith.constant 0.000000e+00 : f32
    %65 = vector.shape_cast %52 : vector<1x128xi1> to vector<1x128xi1>
    %66 = vector.broadcast %65 : vector<1x128xi1> to vector<8x128xi1>
    %67 = vector.broadcast %cst_44 : f32 to vector<8x128xf32>
    %68 = arith.select %66, %64, %67 : vector<8x128xi1>, vector<8x128xf32>
    %69 = arith.addf %57, %68 : vector<8x128xf32>
    %c8_45 = arith.constant 8 : index
    %c0_46 = arith.constant 0 : index
    %70 = vector.load %arg11[%c8_45, %c0_46] : memref<176x128xbf16, #tpu.memory_space<vmem>>, vector<128x128xbf16>
    %c24 = arith.constant 24 : index
    %c0_47 = arith.constant 0 : index
    %71 = vector.load %arg11[%c24, %c0_47] : memref<176x128xbf16, #tpu.memory_space<vmem>>, vector<128x128xbf16>
    %c40 = arith.constant 40 : index
    %c0_48 = arith.constant 0 : index
    %72 = vector.load %arg11[%c40, %c0_48] : memref<176x128xbf16, #tpu.memory_space<vmem>>, vector<128x128xbf16>
    %73 = tpu.concatenate %70, %71, %72 in 1 : vector<128x128xbf16>, vector<128x128xbf16>, vector<128x128xbf16> -> vector<128x384xbf16>
    %c1_49 = arith.constant 1 : index
    %c0_50 = arith.constant 0 : index
    %c0_51 = arith.constant 0 : index
    %74 = vector.load %arg8[%c1_49, %c0_50, %c0_51] : memref<3x8x384xbf16, #tpu.memory_space<vmem>>, vector<1x8x384xbf16>
    %75 = vector.shape_cast %74 : vector<1x8x384xbf16> to vector<8x384xbf16>
    %cst_52 = arith.constant dense<0.000000e+00> : vector<8x128xf32>
    %76 = tpu.matmul %75, %73, %cst_52 {dimension_numbers = #tpu.dot_dimension_numbers<[1], [1], [0], [0], [0, 0, 1, 0], [], []>} : vector<8x384xbf16>, vector<128x384xbf16>, vector<8x128xf32> -> vector<8x128xf32>
    %77 = arith.addf %69, %76 : vector<8x128xf32>
    %c9 = arith.constant 9 : index
    %c0_53 = arith.constant 0 : index
    %78 = vector.load %arg11[%c9, %c0_53] : memref<176x128xbf16, #tpu.memory_space<vmem>>, vector<128x128xbf16>
    %c25 = arith.constant 25 : index
    %c0_54 = arith.constant 0 : index
    %79 = vector.load %arg11[%c25, %c0_54] : memref<176x128xbf16, #tpu.memory_space<vmem>>, vector<128x128xbf16>
    %c41 = arith.constant 41 : index
    %c0_55 = arith.constant 0 : index
    %80 = vector.load %arg11[%c41, %c0_55] : memref<176x128xbf16, #tpu.memory_space<vmem>>, vector<128x128xbf16>
    %81 = tpu.concatenate %78, %79, %80 in 1 : vector<128x128xbf16>, vector<128x128xbf16>, vector<128x128xbf16> -> vector<128x384xbf16>
    %c2_56 = arith.constant 2 : index
    %c0_57 = arith.constant 0 : index
    %c0_58 = arith.constant 0 : index
    %82 = vector.load %arg8[%c2_56, %c0_57, %c0_58] : memref<3x8x384xbf16, #tpu.memory_space<vmem>>, vector<1x8x384xbf16>
    %83 = vector.shape_cast %82 : vector<1x8x384xbf16> to vector<8x384xbf16>
    %cst_59 = arith.constant dense<0.000000e+00> : vector<8x128xf32>
    %84 = tpu.matmul %83, %81, %cst_59 {dimension_numbers = #tpu.dot_dimension_numbers<[1], [1], [0], [0], [0, 0, 1, 0], [], []>} : vector<8x384xbf16>, vector<128x384xbf16>, vector<8x128xf32> -> vector<8x128xf32>
    %cst_60 = arith.constant 0.000000e+00 : f32
    %85 = vector.shape_cast %54 : vector<1x128xi1> to vector<1x128xi1>
    %86 = vector.broadcast %85 : vector<1x128xi1> to vector<8x128xi1>
    %87 = vector.broadcast %cst_60 : f32 to vector<8x128xf32>
    %88 = arith.select %86, %84, %87 : vector<8x128xi1>, vector<8x128xf32>
    %89 = arith.addf %77, %88 : vector<8x128xf32>
    %90 = vector.extract_strided_slice %89 {offsets = [0, 0], sizes = [4, 128], strides = [1, 1]} : vector<8x128xf32> to vector<4x128xf32>
    %91 = vector.extract_strided_slice %89 {offsets = [4, 0], sizes = [4, 128], strides = [1, 1]} : vector<8x128xf32> to vector<4x128xf32>
    %c0_61 = arith.constant 0 : index
    %c0_62 = arith.constant 0 : index
    %c0_63 = arith.constant 0 : index
    %92 = vector.load %arg2[%c0_61, %c0_62, %c0_63] : memref<1x4x128xf32, #tpu.memory_space<vmem>>, vector<1x4x128xf32>
    %93 = vector.shape_cast %92 : vector<1x4x128xf32> to vector<4x128xf32>
    %c0_64 = arith.constant 0 : index
    %c0_65 = arith.constant 0 : index
    %c0_66 = arith.constant 0 : index
    %94 = vector.load %arg3[%c0_64, %c0_65, %c0_66] : memref<1x4x1xf32, #tpu.memory_space<vmem>>, vector<1x4x1xf32>
    %95 = vector.shape_cast %94 : vector<1x4x1xf32> to vector<4x1xf32>
    %96 = vector.broadcast %95 : vector<4x1xf32> to vector<4x128xf32>
    %97 = arith.subf %93, %96 : vector<4x128xf32>
    %c0_67 = arith.constant 0 : index
    %c0_68 = arith.constant 0 : index
    %c0_69 = arith.constant 0 : index
    %98 = vector.load %arg4[%c0_67, %c0_68, %c0_69] : memref<1x4x1xf32, #tpu.memory_space<vmem>>, vector<1x4x1xf32>
    %99 = vector.shape_cast %98 : vector<1x4x1xf32> to vector<4x1xf32>
    %100 = vector.broadcast %99 : vector<4x1xf32> to vector<4x128xf32>
    %101 = arith.mulf %97, %100 : vector<4x128xf32>
    %cst_70 = arith.constant 1.000000e+00 : f32
    %102 = vector.broadcast %cst_70 : f32 to vector<4x128xf32>
    %103 = arith.addf %102, %90 : vector<4x128xf32>
    %104 = arith.mulf %101, %103 : vector<4x128xf32>
    %105 = arith.addf %104, %91 : vector<4x128xf32>
    %c0_71 = arith.constant 0 : index
    %c0_72 = arith.constant 0 : index
    %c0_73 = arith.constant 0 : index
    %106 = vector.load %arg10[%c0_71, %c0_72, %c0_73] : memref<1x4x128xf32, #tpu.memory_space<vmem>>, vector<1x4x128xf32>
    %107 = vector.shape_cast %106 : vector<1x4x128xf32> to vector<4x128xf32>
    %108 = vector.shape_cast %105 : vector<4x128xf32> to vector<1x4x128xf32>
    tpu.vector_store %arg10[%c0_71, %c0_72, %c0_73], %108 {strides = array<i32>} : memref<1x4x128xf32, #tpu.memory_space<vmem>>, vector<1x4x128xf32>,
    return
  }
  func.func @transform_0(%arg0: i32, %arg1: i32) -> (i32, i32, i32) {
    %c0_i32 = arith.constant 0 : i32
    %c0_i32_0 = arith.constant 0 : i32
    return %arg0, %c0_i32, %arg1 : i32, i32, i32
  }
  func.func @transform_1(%arg0: i32, %arg1: i32) -> (i32, i32, i32) {
    %c0_i32 = arith.constant 0 : i32
    %c0_i32_0 = arith.constant 0 : i32
    %c0_i32_1 = arith.constant 0 : i32
    return %arg0, %c0_i32, %c0_i32_0 : i32, i32, i32
  }
  func.func @transform_2(%arg0: i32, %arg1: i32) -> (i32, i32, i32) {
    %c0_i32 = arith.constant 0 : i32
    %c0_i32_0 = arith.constant 0 : i32
    %c0_i32_1 = arith.constant 0 : i32
    return %arg0, %c0_i32, %c0_i32_0 : i32, i32, i32
  }
  func.func @transform_3(%arg0: i32, %arg1: i32) -> (i32, i32, i32, i32) {
    %c0_i32 = arith.constant 0 : i32
    %c0_i32_0 = arith.constant 0 : i32
    %c0_i32_1 = arith.constant 0 : i32
    return %arg0, %arg1, %c0_i32, %c0_i32_0 : i32, i32, i32, i32
  }
  func.func @transform_4(%arg0: i32, %arg1: i32) -> (i32, i32, i32) {
    %c0_i32 = arith.constant 0 : i32
    %c0_i32_0 = arith.constant 0 : i32
    %c0_i32_1 = arith.constant 0 : i32
    %c0_i32_2 = arith.constant 0 : i32
    return %c0_i32, %c0_i32_0, %c0_i32_1 : i32, i32, i32
  }
  func.func @transform_5(%arg0: i32, %arg1: i32) -> (i32, i32) {
    %c0_i32 = arith.constant 0 : i32
    %c0_i32_0 = arith.constant 0 : i32
    %c0_i32_1 = arith.constant 0 : i32
    return %c0_i32, %c0_i32_0 : i32, i32
  }
  func.func @transform_6(%arg0: i32, %arg1: i32) -> (i32, i32, i32) {
    %c0_i32 = arith.constant 0 : i32
    %c0_i32_0 = arith.constant 0 : i32
    %c0_i32_1 = arith.constant 0 : i32
    %c0_i32_2 = arith.constant 0 : i32
    return %c0_i32, %c0_i32_0, %c0_i32_1 : i32, i32, i32
  }
  func.func @transform_7(%arg0: i32, %arg1: i32) -> (i32, i32) {
    %c0_i32 = arith.constant 0 : i32
    %c0_i32_0 = arith.constant 0 : i32
    %c0_i32_1 = arith.constant 0 : i32
    return %c0_i32, %c0_i32_0 : i32, i32
  }
  func.func @transform_8(%arg0: i32, %arg1: i32) -> (i32, i32, i32) {
    %c0_i32 = arith.constant 0 : i32
    %c0_i32_0 = arith.constant 0 : i32
    return %arg0, %c0_i32, %arg1 : i32, i32, i32
  }
}

</mosaic_0001>

<bundles_post_ra>
// kernel: spade_forward.1
= control target key start
LH: loop header
LB: loop body
LE: loop exit
PB: predicated region body
PF: predicated region fallthrough
CT: control target
= control target key end

     0   :  { %s2366_s27 = smov 0   ;;  %s2368_s28 = smov 0   ;;  %s2719_s0 = inlined_call_operand.vmem [shape: f32[2,4,256], index: 0, kind: input, shape index: {}]   ;;  %s2720_s1 = inlined_call_operand.vmem [shape: f32[2,4,1], index: 1, kind: input, shape index: {}]   ;;  %s2721_s2 = inlined_call_operand.vmem [shape: f32[2,4,1], index: 2, kind: input, shape index: {}]   ;;  %s2722_s3 = inlined_call_operand.vmem [shape: bf16[2,2,192,9], index: 3, kind: input, shape index: {}]   ;;  %s2723_s4 = inlined_call_operand.vmem [shape: bf16[3,9,128], index: 4, kind: input, shape index: {}]   ;;  %s2724_s5 = inlined_call_operand.vmem [shape: f32[1,128], index: 5, kind: input, shape index: {}]   ;;  %s2725_s6 = inlined_call_operand.vmem [shape: bf16[3,8,384], index: 6, kind: input, shape index: {}]   ;;  %s2726_s7 = inlined_call_operand.vmem [shape: f32[8,1], index: 7, kind: input, shape index: {}]   ;;  %s2727_s8 = inlined_call_operand.vmem [shape: f32[2,4,256], index: 8, kind: output, shape index: {}]  }
   0x1   :  { %2728 = sst [smem:[#allocation5_spill]] %s2720_s1  ;;  %s2370_s29 = smov 0  }
   0x2   :  { %2729 = sst [smem:[#allocation6_spill]] %s2723_s4  ;;  %s2372_s30 = smov 0  }
   0x3   :  { %s2374_s9 = smov 0  }
   0x4 LB: > { %s27_s10 = sadd.s32 1, %s2307_s29  ;;  %s30_s11 = sadd.s32 1, %s2311_s30  ;;  %s2315_s9 = sphi %s2374_s9, %s18_s9   ;;  %s2311_s30 = sphi %s2372_s30, %s2739_s30   ;;  %s2307_s29 = sphi %s2370_s29, %s2738_s29   ;;  %s2303_s28 = sphi %s2368_s28, %s2737_s28   ;;  %s2299_s27 = sphi %s2366_s27, %s2736_s27  }
   0x5   : > { %p28_p0 = scmp.ge.s32.totalorder %s27_s10, 2  ;;  %p1846_p1 = scmp.ge.s32.totalorder %s2315_s9, 1 }
   0x6   : > { %p315_p2 = scmp.lt.s32.totalorder %s2315_s9, 5 }
   0x7   : > { %s2741_s10 = smov (%p28_p0, %s27_s10), 0  ;;  %s2743_s11 = smov (!%p28_p0, %s30_s11), %s2311_s30 }
   0x8   : > { %2730 = sst [smem:[#allocation3_spill]] %s2741_s10  ;;  %p316_p3 = pnand %p1846_p1, %p315_p2 }
   0x9   : > { %p32_p4 = scmp.ge.s32.totalorder %s2743_s11, 2  ;;  %s2732_s4 = sld [smem:[#allocation6_spill]] (!%p316_p3) }
   0xa   : > { %319 = sbr.rel (%p316_p3) target bundleno = 683 (0x2ab), region = 52  ;;  %p372_p5 = scmp.lt.s32.totalorder (!%p316_p3), %s2303_s28, 1 }
   0xb   : > { %s2745_s11 = smov (%p32_p4, %s2743_s11), 0  ;;  %p374_p6 = scmp.lt.s32.totalorder (!%p316_p3), %s2299_s27, 1 }
   0xc   : > { %2731 = sst [smem:[#allocation4_spill]] %s2745_s11  ;;  %p1984_p7 = scmp.ne.s32.totalorder (!%p316_p3), %s2299_s27, 0 }
   0xd   : > { %s2733_s1 = sld [smem:[#allocation5_spill]] (!%p316_p3) }
   0xf   : > { %v1898_v0 = vld [vmem:[%s2732_s4 + $0x8] sm:$0xf]  ;;  %v2072_v1 = vld [vmem:[%s2732_s4 + $0x8] sm:$0x10]  ;;  %vm519_vm0 = vcmask 1043456   ;;  %vm520_vm1 = vcmask 1044480  }
  0x10   : > { %v1899_v2 = vor.u32 %v2072_v1, %v1898_v0  ;;  %v1916_v3 = vld [vmem:[%s2732_s4] sm:$0xf]  ;;  %v2070_v4 = vld [vmem:[%s2732_s4] sm:$0x10]  ;;  %v2317_v5 = vmov 65535   ;;  %s2747_s28 = smov (!%p372_p5, %s2303_s28), 1 }
  0x11   : > { %v521_v6 = vsel %vm519_vm0, 4294967295, %v2317_v5  ;;  %v1917_v7 = vor.u32 %v2070_v4, %v1916_v3  ;;  %v1972_v8 = vld [vmem:[%s2732_s4 + $0x10] sm:$0xf]  ;;  %v2083_v9 = vld [vmem:[%s2732_s4 + $0x10] sm:$0x10]  ;;  %s375_s24 = scalar_select %p374_p6, %s2299_s27, 1 }
  0x12   : > { %v522_v10 = vsel %vm520_vm1, %v521_v6, 0  ;;  %v1973_v11 = vor.u32 %v2083_v9, %v1972_v8  ;;  %s1847_s25 = sshll.u32 %s2747_s28, 1  ;;  %s1849_s26 = sshll.u32 %s2747_s28, 2  ;;  %vm488_vm2 = vcmask 72704   ;;  %v2496_v37 = vld [vmem:[%s2724_s5] ss:$0 sm:$0xff] }
  0x13   : > { %v524_v12 = vand.u32 %v1899_v2, %v522_v10  ;;  %v599_v13 = vand.u32 %v1917_v7, %v522_v10  ;;  %s377_s12 = sadd.s32 %s1847_s25, %s375_s24  ;;  %s2425_s15 = scalar_lea.vmem %s2733_s1, %s1849_s26 }
  0x14   : > { %v769_v14 = vand.u32 %v1973_v11, %v522_v10  ;;  %s1848_s16 = sshll.u32 %s377_s12, 2  ;;  %s2430_s19 = scalar_lea.vmem %s2721_s2, %s1849_s26 }
  0x15   : > { %533 = vmatpush.bf16.msra.mxu0 %v524_v12  ;;  %608 = vmatpush.bf16.msra.mxu1 %v599_v13  ;;  %s2435_s22 = scalar_lea.vmem %s2719_s0, %s1848_s16  ;;  %s2228_s23 = smul.u32 24, %s375_s24 }
  0x16   : > { %778 = vmatpush.bf16.msra.mxu2 %v769_v14  ;;  %s2229_s4 = smul.u32 48, %s2747_s28  ;;  %s2440_s13 = scalar_lea.vmem %s2727_s8, %s1848_s16 }
  0x18   : > { %s394_s14 = sadd.s32 %s2229_s4, %s2228_s23 }
  0x19   : > { %s1851_s1 = sshll.u32 %s394_s14, 2 }
  0x1a   : > { %s2445_s17 = scalar_lea.vmem %s2722_s3, %s1851_s1 }
  0x1b   : > { %v2061_v15 = vld [vmem:[%s2445_s17 + $0x8] sm:$0xff]  ;;  %v2060_v16 = vld [vmem:[%s2445_s17] sm:$0xff]  ;;  %v2073_v17 = vld [vmem:[%s2445_s17 + $0x10] sm:$0xff] }
  0x1c   : > { %1900 = vmatmul.msk.bf16.vlgmr.msra.gmra.mxu0 %vm488_vm2, %v2061_v15  ;;  %1918 = vmatmul.msk.bf16.vlgmr.msra.gmra.mxu1 %vm488_vm2, %v2060_v16  ;;  %v2062_v18 = vld [vmem:[%s2445_s17 + $0x10] sm:$0xff]  ;;  %v2074_v19 = vld [vmem:[%s2445_s17 + $0x18] sm:$0xff]  ;;  %v2075_v21 = vld [vmem:[%s2445_s17 + $0x20] sm:$0xff] }
  0x1d   : > { %1974 = vmatmul.msk.bf16.vlgmr.msra.gmra.mxu2 %vm488_vm2, %v2073_v17  ;;  %v2063_v20 = vld [vmem:[%s2445_s17 + $0x18] sm:$0xff]  ;;  %v2064_v22 = vld [vmem:[%s2445_s17 + $0x20] sm:$0xff]  ;;  %v2076_v23 = vld [vmem:[%s2445_s17 + $0x28] sm:$0xff] }
  0x1e   : > { %v2065_v24 = vld [vmem:[%s2445_s17 + $0x28] sm:$0xff]  ;;  %v2077_v25 = vld [vmem:[%s2445_s17 + $0x30] sm:$0xff]  ;;  %v2078_v27 = vld [vmem:[%s2445_s17 + $0x38] sm:$0xff] }
  0x1f   : > { %v2066_v26 = vld [vmem:[%s2445_s17 + $0x30] sm:$0xff]  ;;  %v2067_v28 = vld [vmem:[%s2445_s17 + $0x38] sm:$0xff]  ;;  %v2079_v29 = vld [vmem:[%s2445_s17 + $0x40] sm:$0xff] }
  0x20   : > { %v2068_v30 = vld [vmem:[%s2445_s17 + $0x40] sm:$0xff]  ;;  %v2080_v31 = vld [vmem:[%s2445_s17 + $0x48] sm:$0xff]  ;;  %v2081_v35 = vld [vmem:[%s2445_s17 + $0x50] sm:$0xff] }
  0x21   : > { %v2069_v32 = vld [vmem:[%s2445_s17 + $0x48] sm:$0xff]  ;;  %v2071_v46 = vld [vmem:[%s2445_s17 + $0x50] sm:$0xff]  ;;  %v2082_v49 = vld [vmem:[%s2445_s17 + $0x58] sm:$0xff] }
  0x2c   : > { %1901 = vmatmul.msk.bf16.gmra.mxu0 %vm488_vm2, %v2062_v18  ;;  %1919 = vmatmul.msk.bf16.gmra.mxu1 %vm488_vm2, %v2061_v15 }
  0x2d   : > { %1975 = vmatmul.msk.bf16.gmra.mxu2 %vm488_vm2, %v2074_v19 }
  0x3c   : > { %1902 = vmatmul.msk.bf16.gmra.mxu0 %vm488_vm2, %v2063_v20  ;;  %1920 = vmatmul.msk.bf16.gmra.mxu1 %vm488_vm2, %v2062_v18 }
  0x3d   : > { %1976 = vmatmul.msk.bf16.gmra.mxu2 %vm488_vm2, %v2075_v21 }
  0x4c   : > { %1903 = vmatmul.msk.bf16.gmra.mxu0 %vm488_vm2, %v2064_v22  ;;  %1921 = vmatmul.msk.bf16.gmra.mxu1 %vm488_vm2, %v2063_v20 }
  0x4d   : > { %1977 = vmatmul.msk.bf16.gmra.mxu2 %vm488_vm2, %v2076_v23 }
  0x5c   : > { %1904 = vmatmul.msk.bf16.gmra.mxu0 %vm488_vm2, %v2065_v24  ;;  %1922 = vmatmul.msk.bf16.gmra.mxu1 %vm488_vm2, %v2064_v22 }
  0x5d   : > { %1978 = vmatmul.msk.bf16.gmra.mxu2 %vm488_vm2, %v2077_v25 }
  0x6c   : > { %1905 = vmatmul.msk.bf16.gmra.mxu0 %vm488_vm2, %v2066_v26  ;;  %1923 = vmatmul.msk.bf16.gmra.mxu1 %vm488_vm2, %v2065_v24 }
  0x6d   : > { %1979 = vmatmul.msk.bf16.gmra.mxu2 %vm488_vm2, %v2078_v27 }
  0x7c   : > { %1906 = vmatmul.msk.bf16.gmra.mxu0 %vm488_vm2, %v2067_v28  ;;  %1924 = vmatmul.msk.bf16.gmra.mxu1 %vm488_vm2, %v2066_v26 }
  0x7d   : > { %1980 = vmatmul.msk.bf16.gmra.mxu2 %vm488_vm2, %v2079_v29 }
  0x8c   : > { %1907 = vmatmul.msk.bf16.gmra.mxu0 %vm488_vm2, %v2068_v30  ;;  %1925 = vmatmul.msk.bf16.gmra.mxu1 %vm488_vm2, %v2067_v28 }
  0x8d   : > { %1981 = vmatmul.msk.bf16.gmra.mxu2 %vm488_vm2, %v2080_v31 }
  0x99   : > { %v535_v33 = vpop.f32.mrf.mxu0  ;;  %v610_v34 = vpop.f32.mrf.mxu1 }
  0x9a   : > { %v611_v36 = vadd.f32 %v610_v34, %v535_v33 }
  0x9c   : > { %1908 = vmatmul.msk.bf16.gmra.mxu0 %vm488_vm2, %v2069_v32  ;;  %1926 = vmatmul.msk.bf16.gmra.mxu1 %vm488_vm2, %v2068_v30 }
  0x9d   : > { %1982 = vmatmul.msk.bf16.gmra.mxu2 %vm488_vm2, %v2081_v35 }
  0xa0   : > { %v780_v38 = vpop.f32.mrf.mxu2 }
  0xa1   : > { %v830_v39 = vadd.f32 %v780_v38, %v611_v36  ;;  %v537_v40 = vpop.f32.mrf.mxu0  ;;  %v612_v41 = vpop.f32.mrf.mxu1 }
  0xa2   : > { %v613_v50 = vadd.f32 %v612_v41, %v537_v40 }
  0xa3   : > { %v854_v42 = vadd.f32 %v2496_v37, %v830_v39 }
  0xa5   : > { %v874_v43 = vmax.f32 %v854_v42, 0.0 }
  0xa7   : > { %v896_v44 = vpack.c.bf16 %v874_v43, %v874_v43 }
  0xa8   : > { %v782_v45 = vpop.f32.mrf.mxu2 }
  0xa9   : > { %916 = vst [vmem:[#allocation2 + $0x4] sm:$0xf] %v896_v44  ;;  %v540_v47 = vpop.f32.mrf.mxu0  ;;  %v615_v48 = vpop.f32.mrf.mxu1  ;;  %v831_v51 = vadd.f32 %v782_v45, %v613_v50 }
  0xaa   : > { %v616_v52 = vadd.f32 %v615_v48, %v540_v47 }
  0xab   : > { %v855_v54 = vadd.f32 %v2496_v37, %v831_v51 }
  0xac   : > { %1909 = vmatmul.msk.bf16.gmra.mxu0 %vm488_vm2, %v2071_v46  ;;  %1927 = vmatmul.msk.bf16.gmra.mxu1 %vm488_vm2, %v2069_v32 }
  0xad   : > { %1983 = vmatmul.msk.bf16.gmra.mxu2 %vm488_vm2, %v2082_v49  ;;  %v875_v59 = vmax.f32 %v855_v54, 0.0 }
  0xb0   : > { %v785_v53 = vpop.f32.mrf.mxu2 }
  0xb1   : > { %v832_v55 = vadd.f32 %v785_v53, %v616_v52  ;;  %v542_v56 = vpop.f32.mrf.mxu0  ;;  %v617_v57 = vpop.f32.mrf.mxu1 }
  0xb2   : > { %v618_v1 = vadd.f32 %v617_v57, %v542_v56 }
  0xb3   : > { %v856_v58 = vadd.f32 %v2496_v37, %v832_v55 }
  0xb5   : > { %v876_v60 = vmax.f32 %v856_v58, 0.0 }
  0xb7   : > { %v2104_v61 = vpack.c.bf16 %v876_v60, %v875_v59 }
  0xb8   : > { %v787_v62 = vpop.f32.mrf.mxu2 }
  0xb9   : > { %2182 = vst [vmem:[#allocation2 + $0x8] sm:$0xff] %v2104_v61   ;;  %v545_v63 = vpop.f32.mrf.mxu0  ;;  %v620_v0 = vpop.f32.mrf.mxu1  ;;  %v833_v2 = vadd.f32 %v787_v62, %v618_v1 }
  0xba   : > { %v621_v3 = vadd.f32 %v620_v0, %v545_v63 }
  0xbb   : > { %v857_v5 = vadd.f32 %v2496_v37, %v833_v2 }
  0xbd   : > { %v877_v10 = vmax.f32 %v857_v5, 0.0 }
  0xc0   : > { %v790_v4 = vpop.f32.mrf.mxu2 }
  0xc1   : > { %v834_v6 = vadd.f32 %v790_v4, %v621_v3  ;;  %v547_v7 = vpop.f32.mrf.mxu0  ;;  %v622_v8 = vpop.f32.mrf.mxu1 }
  0xc2   : > { %v623_v16 = vadd.f32 %v622_v8, %v547_v7 }
  0xc3   : > { %v858_v9 = vadd.f32 %v2496_v37, %v834_v6 }
  0xc5   : > { %v878_v11 = vmax.f32 %v858_v9, 0.0 }
  0xc7   : > { %v2109_v12 = vpack.c.bf16 %v878_v11, %v877_v10 }
  0xc8   : > { %v792_v13 = vpop.f32.mrf.mxu2 }
  0xc9   : > { %2183 = vst [vmem:[#allocation2 + $0x10] sm:$0xff] %v2109_v12   ;;  %v550_v14 = vpop.f32.mrf.mxu0  ;;  %v625_v15 = vpop.f32.mrf.mxu1  ;;  %v835_v17 = vadd.f32 %v792_v13, %v623_v16 }
  0xca   : > { %v626_v18 = vadd.f32 %v625_v15, %v550_v14 }
  0xcb   : > { %v859_v20 = vadd.f32 %v2496_v37, %v835_v17 }
  0xcd   : > { %v879_v25 = vmax.f32 %v859_v20, 0.0 }
  0xd0   : > { %v795_v19 = vpop.f32.mrf.mxu2 }
  0xd1   : > { %v836_v21 = vadd.f32 %v795_v19, %v626_v18  ;;  %v552_v22 = vpop.f32.mrf.mxu0  ;;  %v627_v23 = vpop.f32.mrf.mxu1 }
  0xd2   : > { %v628_v31 = vadd.f32 %v627_v23, %v552_v22 }
  0xd3   : > { %v860_v24 = vadd.f32 %v2496_v37, %v836_v21 }
  0xd5   : > { %v880_v26 = vmax.f32 %v860_v24, 0.0 }
  0xd7   : > { %v2114_v27 = vpack.c.bf16 %v880_v26, %v879_v25 }
  0xd8   : > { %v797_v28 = vpop.f32.mrf.mxu2 }
  0xd9   : > { %2184 = vst [vmem:[#allocation2 + $0x18] sm:$0xff] %v2114_v27   ;;  %v555_v29 = vpop.f32.mrf.mxu0  ;;  %v630_v30 = vpop.f32.mrf.mxu1  ;;  %v837_v32 = vadd.f32 %v797_v28, %v628_v31 }
  0xda   : > { %v631_v33 = vadd.f32 %v630_v30, %v555_v29 }
  0xdb   : > { %v861_v35 = vadd.f32 %v2496_v37, %v837_v32 }
  0xdd   : > { %v881_v41 = vmax.f32 %v861_v35, 0.0 }
  0xe0   : > { %v800_v34 = vpop.f32.mrf.mxu2 }
  0xe1   : > { %v838_v36 = vadd.f32 %v800_v34, %v631_v33  ;;  %v557_v38 = vpop.f32.mrf.mxu0  ;;  %v632_v39 = vpop.f32.mrf.mxu1 }
  0xe2   : > { %v633_v47 = vadd.f32 %v632_v39, %v557_v38 }
  0xe3   : > { %v862_v40 = vadd.f32 %v2496_v37, %v838_v36  ;;  %v2318_v36 = vmov 0  }
  0xe4   : > { %894 = vst [vmem:[#allocation2] sm:$0xf] %v2318_v36 }
  0xe5   : > { %v882_v42 = vmax.f32 %v862_v40, 0.0  ;;  %895 = vst [vmem:[#allocation2 + $0x54] sm:$0xf] %v2318_v36 }
  0xe7   : > { %v2119_v43 = vpack.c.bf16 %v882_v42, %v881_v41 }
  0xe8   : > { %v802_v44 = vpop.f32.mrf.mxu2 }
  0xe9   : > { %2185 = vst [vmem:[#allocation2 + $0x20] sm:$0xff] %v2119_v43   ;;  %v560_v45 = vpop.f32.mrf.mxu0  ;;  %v635_v46 = vpop.f32.mrf.mxu1  ;;  %v839_v48 = vadd.f32 %v802_v44, %v633_v47 }
  0xea   : > { %v636_v49 = vadd.f32 %v635_v46, %v560_v45 }
  0xeb   : > { %v863_v51 = vadd.f32 %v2496_v37, %v839_v48 }
  0xed   : > { %v883_v56 = vmax.f32 %v863_v51, 0.0 }
  0xf0   : > { %v805_v50 = vpop.f32.mrf.mxu2 }
  0xf1   : > { %v840_v52 = vadd.f32 %v805_v50, %v636_v49  ;;  %v562_v53 = vpop.f32.mrf.mxu0  ;;  %v637_v54 = vpop.f32.mrf.mxu1 }
  0xf2   : > { %v638_v62 = vadd.f32 %v637_v54, %v562_v53 }
  0xf3   : > { %v864_v55 = vadd.f32 %v2496_v37, %v840_v52 }
  0xf5   : > { %v884_v57 = vmax.f32 %v864_v55, 0.0 }
  0xf7   : > { %v2124_v58 = vpack.c.bf16 %v884_v57, %v883_v56 }
  0xf8   : > { %v807_v59 = vpop.f32.mrf.mxu2 }
  0xf9   : > { %2186 = vst [vmem:[#allocation2 + $0x28] sm:$0xff] %v2124_v58   ;;  %v565_v60 = vpop.f32.mrf.mxu0  ;;  %v640_v61 = vpop.f32.mrf.mxu1  ;;  %v841_v63 = vadd.f32 %v807_v59, %v638_v62 }
  0xfa   : > { %v641_v0 = vadd.f32 %v640_v61, %v565_v60 }
  0xfb   : > { %v865_v2 = vadd.f32 %v2496_v37, %v841_v63 }
  0xfd   : > { %v885_v7 = vmax.f32 %v865_v2, 0.0 }
 0x100   : > { %v810_v1 = vpop.f32.mrf.mxu2 }
 0x101   : > { %v842_v3 = vadd.f32 %v810_v1, %v641_v0  ;;  %v567_v4 = vpop.f32.mrf.mxu0  ;;  %v642_v5 = vpop.f32.mrf.mxu1 }
 0x102   : > { %v643_v13 = vadd.f32 %v642_v5, %v567_v4 }
 0x103   : > { %v866_v6 = vadd.f32 %v2496_v37, %v842_v3 }
 0x105   : > { %v886_v8 = vmax.f32 %v866_v6, 0.0 }
 0x107   : > { %v2129_v9 = vpack.c.bf16 %v886_v8, %v885_v7 }
 0x108   : > { %v812_v10 = vpop.f32.mrf.mxu2 }
 0x109   : > { %2187 = vst [vmem:[#allocation2 + $0x30] sm:$0xff] %v2129_v9   ;;  %v570_v11 = vpop.f32.mrf.mxu0  ;;  %v645_v12 = vpop.f32.mrf.mxu1  ;;  %v843_v14 = vadd.f32 %v812_v10, %v643_v13 }
 0x10a   : > { %v646_v15 = vadd.f32 %v645_v12, %v570_v11 }
 0x10b   : > { %v867_v17 = vadd.f32 %v2496_v37, %v843_v14 }
 0x10d   : > { %v887_v22 = vmax.f32 %v867_v17, 0.0 }
 0x110   : > { %v815_v16 = vpop.f32.mrf.mxu2 }
 0x111   : > { %v844_v18 = vadd.f32 %v815_v16, %v646_v15  ;;  %v572_v19 = vpop.f32.mrf.mxu0  ;;  %v647_v20 = vpop.f32.mrf.mxu1 }
 0x112   : > { %v648_v28 = vadd.f32 %v647_v20, %v572_v19 }
 0x113   : > { %v868_v21 = vadd.f32 %v2496_v37, %v844_v18 }
 0x115   : > { %v888_v23 = vmax.f32 %v868_v21, 0.0 }
 0x117   : > { %v2134_v24 = vpack.c.bf16 %v888_v23, %v887_v22 }
 0x118   : > { %v817_v25 = vpop.f32.mrf.mxu2 }
 0x119   : > { %2188 = vst [vmem:[#allocation2 + $0x38] sm:$0xff] %v2134_v24   ;;  %v575_v26 = vpop.f32.mrf.mxu0  ;;  %v650_v27 = vpop.f32.mrf.mxu1  ;;  %v845_v29 = vadd.f32 %v817_v25, %v648_v28 }
 0x11a   : > { %v651_v30 = vadd.f32 %v650_v27, %v575_v26 }
 0x11b   : > { %v869_v32 = vadd.f32 %v2496_v37, %v845_v29 }
 0x11d   : > { %v889_v39 = vmax.f32 %v869_v32, 0.0 }
 0x120   : > { %v820_v31 = vpop.f32.mrf.mxu2 }
 0x121   : > { %v846_v33 = vadd.f32 %v820_v31, %v651_v30  ;;  %v577_v34 = vpop.f32.mrf.mxu0  ;;  %v652_v35 = vpop.f32.mrf.mxu1 }
 0x122   : > { %v653_v45 = vadd.f32 %v652_v35, %v577_v34 }
 0x123   : > { %v870_v38 = vadd.f32 %v2496_v37, %v846_v33 }
 0x125   : > { %v890_v40 = vmax.f32 %v870_v38, 0.0 }
 0x127   : > { %v2139_v41 = vpack.c.bf16 %v890_v40, %v889_v39 }
 0x128   : > { %v822_v42 = vpop.f32.mrf.mxu2 }
 0x129   : > { %2189 = vst [vmem:[#allocation2 + $0x40] sm:$0xff] %v2139_v41   ;;  %v580_v43 = vpop.f32.mrf.mxu0  ;;  %v655_v44 = vpop.f32.mrf.mxu1  ;;  %v847_v46 = vadd.f32 %v822_v42, %v653_v45 }
 0x12a   : > { %v656_v47 = vadd.f32 %v655_v44, %v580_v43 }
 0x12b   : > { %v871_v49 = vadd.f32 %v2496_v37, %v847_v46 }
 0x12d   : > { %v891_v54 = vmax.f32 %v871_v49, 0.0 }
 0x130   : > { %v825_v48 = vpop.f32.mrf.mxu2 }
 0x131   : > { %v848_v50 = vadd.f32 %v825_v48, %v656_v47  ;;  %v582_v52 = vpop.f32.mrf.mxu0  ;;  %v657_v53 = vpop.f32.mrf.mxu1 }
 0x132   : > { %v658_v57 = vadd.f32 %v657_v53, %v582_v52 }
 0x133   : > { %v872_v51 = vadd.f32 %v2496_v37, %v848_v50 }
 0x135   : > { %v892_v55 = vmax.f32 %v872_v51, 0.0 }
 0x137   : > { %v2144_v56 = vpack.c.bf16 %v892_v55, %v891_v54 }
 0x138   : > { %v827_v58 = vpop.f32.mrf.mxu2 }
 0x139   : > { %2190 = vst [vmem:[#allocation2 + $0x48] sm:$0xff] %v2144_v56   ;;  %v849_v59 = vadd.f32 %v827_v58, %v658_v57 }
 0x13b   : > { %v873_v60 = vadd.f32 %v2496_v37, %v849_v59 }
 0x13d   : > { %v893_v61 = vmax.f32 %v873_v60, 0.0  ;;  %939 = sbr.rel (%p1984_p7) target bundleno = 325 (0x145), region = 56 }
 0x13f   : > { %v915_v62 = vpack.c.bf16 %v893_v61, %v893_v61 }
 0x141   : > { %935 = vst [vmem:[#allocation2 + $0x50] sm:$0xf] %v915_v62 }
 0x142   : > { %v2319_v63 = vmov 0  }
 0x143   : > { %940 = vst [vmem:[#allocation2 + $0x4] sm:$0xf] %v2319_v63 }
 0x144   : > { %941 = vst [vmem:[#allocation2 + $0x8] sm:$0xf] %v2319_v63 }
 0x145 PF: > { %p1985_p8 = scmp.ne.s32.totalorder %s2299_s27, 1 }
 0x147   : > { %945 = sbr.rel (%p1985_p8) target bundleno = 335 (0x14f), region = 60 }
 0x14c   : > { %v2320_v0 = vmov 0  }
 0x14d   : > { %946 = vst [vmem:[#allocation2 + $0x4c] sm:$0xf] %v2320_v0 }
 0x14e   : > { %947 = vst [vmem:[#allocation2 + $0x50] sm:$0xf] %v2320_v0 }
 0x14f PF: > { %v2197_v1 = vld [vmem:[#allocation2 + $0x38] sm:$0xff]   ;;  %v2525_v2 = vld [vmem:[#allocation2 + $0x40] sm:$0xff]   ;;  %2275 = vset.pattern.permute.xlu0 %v2318_v36  ;;  %2276 = vset.pattern.permute.xlu1 %v2318_v36  ;;  %v2196_v5 = vld [vmem:[#allocation2 + $0x30] sm:$0xff]   ;;  %vm1067_vm3 = vsmask.f32 4352 }
 0x150   : > { %v2176_v37 = vunpack.c.l.b16 %v2525_v2  ;;  %v1149_v3 = vshrl.u32 %v2197_v1, 16  ;;  %v1152_v4 = vshll.u32 %v2197_v1, 16  ;;  %v1140_v11 = vshrl.u32 %v2196_v5, 16  ;;  %v2195_v19 = vld [vmem:[#allocation2 + $0x28] sm:$0xff]   ;;  %v2194_v27 = vld [vmem:[#allocation2 + $0x20] sm:$0xff]   ;;  %v2539_v33 = vld [vmem:[#allocation2 + $0x18] sm:$0xff]  }
 0x151   : > { %v1143_v12 = vshll.u32 %v2196_v5, 16  ;;  %v1131_v22 = vshrl.u32 %v2195_v19, 16  ;;  %v1134_v23 = vshll.u32 %v2195_v19, 16  ;;  %v1122_v29 = vshrl.u32 %v2194_v27, 16  ;;  %v2566_v63 = vld [vmem:[#allocation2 + $0x10] sm:$0xff]  }
 0x152   : > { %v1035_v6 = vpack.c.b16 %v2176_v37, %v2176_v37  ;;  %v1151_v7 = vrot.slane %v1149_v3, 3  ;;  %v1154_v8 = vrot.slane %v1152_v4, 4  ;;  %v1142_v17 = vrot.slane %v1140_v11, 3  ;;  %v2574_v5 = vld [vmem:[#allocation2 + $0x34] sm:$0xff]   ;;  %v2583_v11 = vld [vmem:[#allocation2 + $0x8] sm:$0xff]  }
 0x153   : > { %v1145_v18 = vrot.slane %v1143_v12, 4  ;;  %v1133_v25 = vrot.slane %v1131_v22, 3  ;;  %v1136_v26 = vrot.slane %v1134_v23, 4  ;;  %v1125_v30 = vshll.u32 %v2194_v27, 16  ;;  %v970_v12 = vld [vmem:[#allocation2] sm:$0x8] }
 0x154   : > { %v1176_v9 = vshrl.u32 %v1035_v6, 16  ;;  %v1179_v10 = vshll.u32 %v1035_v6, 16  ;;  %v2528_v13 = vor.u32 %v1154_v8, %v1151_v7  ;;  %v1124_v35 = vrot.slane %v1122_v29, 3  ;;  %v2544_v38 = vld [vmem:[#allocation2 + $0x48] sm:$0xff]  }
 0x155   : > { %v1146_v21 = vor.u32 %v1145_v18, %v1142_v17  ;;  %v1137_v28 = vor.u32 %v1136_v26, %v1133_v25  ;;  %v992_v31 = vld [vmem:[#allocation2 + $0x50] sm:$0xf]  ;;  %v1127_v36 = vrot.slane %v1125_v30, 4  ;;  %v2177_v40 = vunpack.c.h.b16 %v2525_v2 }
 0x156   : > { %v1178_v14 = vrot.slane %v1176_v9, 3  ;;  %v1181_v15 = vrot.slane %v1179_v10, 4  ;;  %v2537_v32 = vunpack.c.l.b16 %v992_v31  ;;  %v2180_v41 = vunpack.c.l.b16 %v2544_v38  ;;  %v2607_v31 = vld [vmem:[#allocation2 + $0x24] sm:$0xff]  }
 0x157   : > { %v2534_v24 = vsel %vm1067_vm3, %v1146_v21, %v2528_v13  ;;  %v2542_v34 = vsel %vm1067_vm3, %v1137_v28, %v1146_v21  ;;  %v1111_v42 = vshrl.u32 %v2539_v33, 16  ;;  %v1167_v43 = vshrl.u32 %v2544_v38, 16 }
 0x158   : > { %v1182_v16 = vor.u32 %v1181_v15, %v1178_v14  ;;  %v1053_v39 = vpack.c.b16 %v2537_v32, %v2537_v32  ;;  %v1170_v44 = vshll.u32 %v2544_v38, 16  ;;  %v1114_v46 = vshll.u32 %v2539_v33, 16  ;;  %v2585_v14 = vld [vmem:[#allocation2 + $0x4] sm:$0xf] }
 0x159   : > { %v2555_v47 = vpack.c.b16 %v2180_v41, %v2177_v40  ;;  %v2173_v49 = vunpack.c.h.b16 %v2197_v1  ;;  %v1128_v50 = vor.u32 %v1127_v36, %v1124_v35  ;;  %v1169_v51 = vrot.slane %v1167_v43, 3 }
 0x15a   : > { %v1183_v20 = vsel %vm1067_vm3, %v2528_v13, %v1182_v16  ;;  %v1194_v45 = vshrl.u32 %v1053_v39, 16  ;;  %v1197_v48 = vshll.u32 %v1053_v39, 16  ;;  %v1172_v52 = vrot.slane %v1170_v44, 4  ;;  %v2614_v44 = vld [vmem:[#allocation2 + $0x1c] sm:$0xff]  }
 0x15b   : > { %1216 = vmatpush.bf16.xpose.msra.mxu3 %v1183_v20  ;;  %1306 = vmatpush.bf16.xpose.msrb.mxu2 %v2555_v47  ;;  %v2558_v55 = vpack.c.b16 %v2176_v37, %v2173_v49  ;;  %v1158_v56 = vshrl.u32 %v2525_v2, 16  ;;  %v1161_v57 = vshll.u32 %v2525_v2, 16  ;;  %v2564_v60 = vsel %vm1067_vm3, %v1128_v50, %v1137_v28  ;;  %v2593_v20 = vld [vmem:[#allocation2 + $0x2c] sm:$0xff]  }
 0x15c   : > { %v1196_v53 = vrot.slane %v1194_v45, 3  ;;  %v1199_v54 = vrot.slane %v1197_v48, 4  ;;  %v1173_v58 = vor.u32 %v1172_v52, %v1169_v51  ;;  %v1113_v61 = vrot.slane %v1111_v42, 3  ;;  %v990_v52 = vld [vmem:[#allocation2 + $0x10] sm:$0x8] }
 0x15d   : > { %1293 = vmatpush.bf16.xpose.msrb.mxu1 %v2558_v55  ;;  %v1116_v62 = vrot.slane %v1114_v46, 4  ;;  %v1160_v1 = vrot.slane %v1158_v56, 3  ;;  %v1163_v37 = vrot.slane %v1161_v57, 4  ;;  %v1094_v2 = vshrl.u32 %v2566_v63, 16  ;;  %v2633_v57 = vld [vmem:[%s2725_s6] sm:$0xff] }
 0x15e   : > { %v1200_v59 = vor.u32 %v1199_v54, %v1196_v53  ;;  %v1097_v3 = vshll.u32 %v2566_v63, 16  ;;  %v1077_v16 = vshrl.u32 %v2583_v11, 16  ;;  %v1080_v17 = vshll.u32 %v2583_v11, 16 }
 0x15f   : > { %v2572_v4 = vor.u32 %v1116_v62, %v1113_v61  ;;  %v1164_v6 = vor.u32 %v1163_v37, %v1160_v1  ;;  %v1096_v7 = vrot.slane %v1094_v2, 3  ;;  %v1010_v18 = vunpack.c.l.b16 %v970_v12 }
 0x160   : > { %v1201_v0 = vsel %vm1067_vm3, %v1173_v58, %v1200_v59  ;;  %v1099_v8 = vrot.slane %v1097_v3, 4  ;;  %v1011_v19 = vunpack.c.l.b16 %v2585_v14  ;;  %v1079_v22 = vrot.slane %v1077_v16, 3  ;;  %v2100_v59 = vld [vmem:[#allocation2 + $0x4c] sm:$0xff] }
 0x161   : > { %1242 = vmatpush.bf16.xpose.msrb.mxu0 %v1201_v0  ;;  %v1174_v9 = vsel %vm1067_vm3, %v1164_v6, %v1173_v58  ;;  %v2581_v10 = vsel %vm1067_vm3, %v2572_v4, %v1128_v50  ;;  %v1082_v23 = vrot.slane %v1080_v17, 4  ;;  %v1044_v26 = vpack.c.b16 %v2180_v41, %v2180_v41  ;;  %v1352_v3 = vld [vmem:[#allocation2 + $0x4c] sm:$0x1] }
 0x162   : > { %v2588_v15 = vor.u32 %v1099_v8, %v1096_v7  ;;  %v1027_v25 = vpack.c.b16 %v1011_v19, %v1010_v18  ;;  %v1165_v27 = vsel %vm1067_vm3, %v2528_v13, %v1164_v6  ;;  %v2153_v49 = vunpack.c.h.b16 %v2566_v63  ;;  %v2092_v18 = vld [vmem:[#allocation2 + $0x44] sm:$0xff] }
 0x163   : > { %1217 = vmatpush.bf16.xpose.msra.mxu3 %v2534_v24  ;;  %1307 = vmatpush.bf16.xpose.msrb.mxu2 %v2558_v55  ;;  %v1083_v28 = vor.u32 %v1082_v23, %v1079_v22  ;;  %v1185_v35 = vshrl.u32 %v1044_v26, 16  ;;  %v1188_v36 = vshll.u32 %v1044_v26, 16  ;;  %v2156_v50 = vunpack.c.l.b16 %v2539_v33  ;;  %v1369_v33 = vld [vmem:[#allocation2 + $0x54] sm:$0x1] }
 0x164   : > { %v2600_v21 = vsel %vm1067_vm3, %v2588_v15, %v2572_v4  ;;  %v1069_v29 = vshrl.u32 %v1027_v25, 16  ;;  %v1072_v30 = vshll.u32 %v1027_v25, 16  ;;  %v1048_v53 = vunpack.c.l.b16 %v990_v52 }
 0x165   : > { %1294 = vmatpush.bf16.xpose.msrb.mxu1 %v2574_v5  ;;  %v1119_v39 = vsel %vm1067_vm3, %v1083_v28, %v2588_v15  ;;  %v1187_v13 = vrot.slane %v1185_v35, 3  ;;  %v1190_v42 = vrot.slane %v1188_v36, 4  ;;  %v2624_v51 = vpack.c.b16 %v2156_v50, %v2153_v49 }
 0x166   : > { %v1071_v40 = vrot.slane %v1069_v29, 3  ;;  %v1074_v41 = vrot.slane %v1072_v30, 4  ;;  %v2149_v54 = vunpack.c.h.b16 %v2583_v11  ;;  %v2152_v56 = vunpack.c.l.b16 %v2566_v63  ;;  %v1349_v63 = vld [vmem:[#allocation2 + $0x44] sm:$0x1] }
 0x167   : > { %v1191_v45 = vor.u32 %v1190_v42, %v1187_v13  ;;  %v1058_v58 = vunpack.c.l.b16 %v2633_v57  ;;  %v1454_v61 = vunpack.c.l.b16 %v1369_v33  ;;  %v1051_v62 = vpack.c.b16 %v2153_v49, %v1048_v53  ;;  %v2090_v33 = vld [vmem:[#allocation2 + $0x34] sm:$0xff] }
 0x168   : > { %v1075_v43 = vor.u32 %v1074_v41, %v1071_v40  ;;  %v1260_v0 = vpack.c.b16 %v2152_v56, %v2149_v54  ;;  %v1603_v2 = vshll.u32 %v2100_v59, 16  ;;  %v1620_v7 = vshrl.u32 %v2100_v59, 16  ;;  %v2099_v41 = vld [vmem:[#allocation2 + $0x44] sm:$0xff] }
 0x169   : > { %1243 = vmatpush.bf16.xpose.msrb.mxu0 %v1174_v9  ;;  %v1192_v48 = vsel %vm1067_vm3, %v1164_v6, %v1191_v45  ;;  %v1061_v1 = vpack.c.b16 %v1058_v58, %v1058_v58  ;;  %v1463_v37 = vpack.c.b16 %v1454_v61, %v1454_v61  ;;  %v2091_v9 = vld [vmem:[#allocation2 + $0x3c] sm:$0xff]  ;;  %v1403_v12 = vunpack.c.l.b16 %v1349_v63 }
 0x16a   : > { %v1084_v46 = vsel %vm1067_vm3, %v1075_v43, %v1083_v28  ;;  %v1605_v6 = vrot.slane %v1603_v2, 1  ;;  %v1103_v16 = vshrl.u32 %v1051_v62, 16  ;;  %v1106_v17 = vshll.u32 %v1051_v62, 16 }
 0x16b   : > { %1218 = vmatpush.bf16.xpose.msra.mxu3 %v2542_v34  ;;  %1308 = vmatpush.bf16.xpose.msrb.mxu2 %v2574_v5  ;;  %v1624_v8 = vshll.u32 %v1463_v37, 16  ;;  %v1418_v22 = vunpack.c.l.b16 %v1352_v3  ;;  %v1412_v26 = vpack.c.b16 %v1403_v12, %v1403_v12  ;;  %vm1478_vm4 = vsmask.f32 7424  ;;  %v2098_v37 = vld [vmem:[#allocation2 + $0x3c] sm:$0xff] }
 0x16c   : > { %v1622_v23 = vor.u32 %v1620_v7, %v1605_v6  ;;  %v1105_v28 = vrot.slane %v1103_v16, 3  ;;  %v1108_v29 = vrot.slane %v1106_v17, 4  ;;  %v2148_v30 = vunpack.c.l.b16 %v2583_v11  ;;  %v987_v7 = vld [vmem:[#allocation2 + $0x8] sm:$0x8]  ;;  %v2089_v16 = vld [vmem:[#allocation2 + $0x2c] sm:$0xff] }
 0x16d   : > { %1295 = vmatpush.bf16.xpose.msrb.mxu1 %v2593_v20  ;;  %v1626_v25 = vrot.slane %v1624_v8, 1  ;;  %v1608_v40 = vshll.u32 %v1412_v26, 16  ;;  %v1420_v43 = vpack.c.b16 %v1418_v22, %v1418_v22  ;;  %v1595_v45 = vshll.u32 %v2092_v18, 16  ;;  %v1055_v26 = vld [vmem:[%s2725_s6 + $0x8] sm:$0xf] }
 0x16e   : > { %v1109_v13 = vor.u32 %v1108_v29, %v1105_v28  ;;  %v1259_v42 = vpack.c.b16 %v2148_v30, %v1011_v19  ;;  %v1587_v56 = vshll.u32 %v2099_v41, 16  ;;  %v1599_v14 = vshrl.u32 %v2099_v41, 16  ;;  %v2088_v41 = vld [vmem:[#allocation2 + $0x24] sm:$0xff] }
 0x16f   : > { %v1627_v35 = vsel %vm1478_vm4, %v1622_v23, %v1626_v25  ;;  %v1597_v50 = vrot.slane %v1595_v45, 1  ;;  %v1616_v52 = vshll.u32 %v1420_v43, 16  ;;  %v1563_v61 = vshll.u32 %v2090_v33, 16 }
 0x170   : > { %v1118_v49 = vsel %vm1067_vm3, %v1109_v13, %v2572_v4  ;;  %v1589_v19 = vrot.slane %v1587_v56, 1  ;;  %v1571_v3 = vshll.u32 %v2098_v37, 16  ;;  %v1583_v12 = vshrl.u32 %v2098_v37, 16 }
 0x171   : > { %1244 = vmatpush.bf16.xpose.msrb.mxu0 %v1165_v27  ;;  %v1618_v59 = vrot.slane %v1616_v52, 1  ;;  %v1039_v22 = vunpack.c.l.b16 %v987_v7  ;;  %v1559_v25 = vshrl.u32 %v2089_v16, 16  ;;  %v1060_v28 = vunpack.c.l.b16 %v1055_v26 }
 0x172   : > { %v1601_v4 = vor.u32 %v1599_v14, %v1589_v19  ;;  %v2181_v14 = vunpack.c.h.b16 %v2544_v38 }
 0x173   : > { %1219 = vmatpush.bf16.xpose.msra.mxu3 %v2564_v60  ;;  %1309 = vmatpush.bf16.xpose.msrb.mxu2 %v2593_v20 }
 0x174   : > { %v1606_v2 = vsel %vm1478_vm4, %v1601_v4, %v1605_v6 }
 0x175   : > { %1296 = vmatpush.bf16.xpose.msrb.mxu1 %v2607_v31 }
 0x179   : > { %1245 = vmatpush.bf16.xpose.msrb.mxu0 %v2534_v24 }
 0x17b   : > { %1220 = vmatpush.bf16.xpose.msra.mxu3 %v2581_v10  ;;  %1310 = vmatpush.bf16.xpose.msrb.mxu2 %v2607_v31 }
 0x17d   : > { %1297 = vmatpush.bf16.xpose.msrb.mxu1 %v2614_v44 }
 0x181   : > { %1246 = vmatpush.bf16.xpose.msrb.mxu0 %v2542_v34 }
 0x183   : > { %1221 = vmatpush.bf16.xpose.msra.mxu3 %v2600_v21  ;;  %1311 = vmatpush.bf16.xpose.msrb.mxu2 %v2614_v44 }
 0x185   : > { %1298 = vmatpush.bf16.xpose.msrb.mxu1 %v2624_v51 }
 0x189   : > { %1247 = vmatpush.bf16.xpose.msrb.mxu0 %v2564_v60 }
 0x18b   : > { %1222 = vmatpush.bf16.xpose.msra.mxu3 %v1119_v39  ;;  %1312 = vmatpush.bf16.xpose.msrb.mxu2 %v2624_v51  ;;  %v1591_v39 = vshrl.u32 %v2091_v9, 16 }
 0x18d   : > { %1299 = vmatpush.bf16.xpose.msrb.mxu1 %v1260_v0 }
 0x191   : > { %1248 = vmatpush.bf16.xpose.msrb.mxu0 %v2581_v10 }
 0x193   : > { %1223 = vmatpush.bf16.xpose.msra.mxu3 %v1084_v46  ;;  %1313 = vmatpush.bf16.xpose.msrb.mxu2 %v1260_v0  ;;  %v1610_v46 = vrot.slane %v1608_v40, 1  ;;  %v1565_v0 = vrot.slane %v1563_v61, 1 }
 0x195   : > { %1300 = vmatpush.bf16.xpose.msrb.mxu1 %v1259_v42  ;;  %v1531_v42 = vshll.u32 %v2088_v41, 16 }
 0x197   : > { %v1533_v11 = vrot.slane %v1531_v42, 1 }
 0x199   : > { %1249 = vmatpush.bf16.xpose.msrb.mxu0 %v1118_v49 }
 0x19a   : > { %1224 = vmatmul.bf16.vlgmr.msra.gmra.mxu3 %v1061_v1  ;;  %v1575_v1 = vshrl.u32 %v2090_v33, 16 }
 0x19b   : > { %1229 = vmatpush.bf16.xpose.msrb.mxu3 %v1192_v48  ;;  %1672 = vmatpush.bf16.xpose.msra.mxu2 %v1627_v35  ;;  %v1612_v48 = vshrl.u32 %v2092_v18, 16  ;;  %v1547_v18 = vshll.u32 %v2089_v16, 16  ;;  %v1042_v35 = vpack.c.b16 %v2149_v54, %v1039_v22  ;;  %v1543_v54 = vshrl.u32 %v2088_v41, 16  ;;  %v2093_v41 = vld [vmem:[#allocation2 + $0x14] sm:$0xff] }
 0x19c   : > { %v1577_v63 = vor.u32 %v1575_v1, %v1565_v0  ;;  %v2095_v1 = vld [vmem:[#allocation2 + $0x24] sm:$0xff] }
 0x19d   : > { %v1614_v58 = vor.u32 %v1612_v48, %v1597_v50  ;;  %v1549_v23 = vrot.slane %v1547_v18, 1  ;;  %v1086_v43 = vshrl.u32 %v1042_v35, 16  ;;  %v1089_v45 = vshll.u32 %v1042_v35, 16  ;;  %v2094_v18 = vld [vmem:[#allocation2 + $0x1c] sm:$0xff] }
 0x19e   : > { %v1545_v48 = vor.u32 %v1543_v54, %v1533_v11  ;;  %v1535_v7 = vshrl.u32 %v2095_v1, 16  ;;  %v2084_v54 = vld [vmem:[#allocation2 + $0x4] sm:$0xff] }
 0x19f   : > { %v1619_v62 = vsel %vm1478_vm4, %v1614_v58, %v1618_v59  ;;  %v1561_v29 = vor.u32 %v1559_v25, %v1549_v23  ;;  %v1091_v52 = vrot.slane %v1089_v45, 4  ;;  %v2087_v58 = vld [vmem:[#allocation2 + $0x1c] sm:$0xff]  ;;  %v1507_v25 = vshll.u32 %v2094_v18, 16 }
 0x1a0   : > { %1659 = vmatpush.bf16.xpose.msra.mxu1 %v1619_v62  ;;  %v1515_v59 = vshll.u32 %v2087_v58, 16  ;;  %v964_v62 = vld [vmem:[%s2726_s7] sm:$0xff] }
 0x1a1   : > { %967 = vperm.xlu0 %2275, %v964_v62   ;;  %v1697_v62 = vld [vmem:[%s2430_s19] sm:$0xf] }
 0x1a2   : > { %v1517_v4 = vrot.slane %v1515_v59, 1  ;;  %1700 = vperm.xlu1 %2276, %v1697_v62  }
 0x1a3   : > { %1230 = vmatpush.bf16.xpose.msrb.mxu3 %v1165_v27  ;;  %v1579_v27 = vshll.u32 %v2091_v9, 16  ;;  %1673 = vmatpush.bf16.xpose.msra.mxu2 %v1606_v2  ;;  %v1573_v9 = vrot.slane %v1571_v3, 1  ;;  %v1523_v2 = vshll.u32 %v2095_v1, 16 }
 0x1a5   : > { %v1581_v36 = vrot.slane %v1579_v27, 1  ;;  %v1585_v17 = vor.u32 %v1583_v12, %v1573_v9  ;;  %v2097_v27 = vld [vmem:[#allocation2 + $0x34] sm:$0xff]  ;;  %v1525_v3 = vrot.slane %v1523_v2, 1 }
 0x1a6   : > { %v1555_v30 = vshll.u32 %v2097_v27, 16  ;;  %v1567_v40 = vshrl.u32 %v2097_v27, 16  ;;  %v1509_v27 = vrot.slane %v1507_v25, 1 }
 0x1a7   : > { %v1582_v8 = vsel %vm1478_vm4, %v1577_v63, %v1581_v36  ;;  %v1590_v6 = vsel %vm1478_vm4, %v1585_v17, %v1589_v19  ;;  %v1277_v63 = vpack.c.b16 %v2537_v32, %v2181_v14  ;;  %v1537_v12 = vor.u32 %v1535_v7, %v1525_v3 }
 0x1ab   : > { %1231 = vmatpush.bf16.xpose.msrb.mxu3 %v2534_v24  ;;  %v1593_v24 = vor.u32 %v1591_v39, %v1581_v36  ;;  %1674 = vmatpush.bf16.xpose.msra.mxu2 %v1590_v6  ;;  %v1063_v36 = vpack.c.b16 %v1060_v28, %v1060_v28  ;;  %v1557_v39 = vrot.slane %v1555_v30, 1  ;;  %v1519_v28 = vshrl.u32 %v2094_v18, 16 }
 0x1ad   : > { %v1611_v53 = vsel %vm1478_vm4, %v1593_v24, %v1610_v46  ;;  %1250 = vmatmul.bf16.vlgmr.msrb.gmra.mxu0 %v1063_v36  ;;  %v1569_v13 = vor.u32 %v1567_v40, %v1557_v39  ;;  %v2096_v46 = vld [vmem:[#allocation2 + $0x2c] sm:$0xff]  ;;  %v1521_v30 = vor.u32 %v1519_v28, %v1509_v27 }
 0x1ae   : > { %1646 = vmatpush.bf16.xpose.msra.mxu0 %v1611_v53  ;;  %v1539_v49 = vshll.u32 %v2096_v46, 16  ;;  %v1550_v53 = vsel %vm1478_vm4, %v1545_v48, %v1549_v23  ;;  %v1551_v33 = vshrl.u32 %v2096_v46, 16 }
 0x1af   : > { %v1526_v36 = vsel %vm1478_vm4, %v1521_v30, %v1525_v3 }
 0x1b0   : > { %v1541_v56 = vrot.slane %v1539_v49, 1  ;;  %v1480_v49 = vshrl.u32 %v2084_v54, 16 }
 0x1b3   : > { %1232 = vmatpush.bf16.xpose.msrb.mxu3 %v2542_v34  ;;  %v1598_v34 = vsel %vm1478_vm4, %v1593_v24, %v1597_v50  ;;  %v1574_v24 = vsel %vm1478_vm4, %v1569_v13, %v1573_v9  ;;  %v1088_v50 = vrot.slane %v1086_v43, 3  ;;  %v1059_v9 = vunpack.c.h.b16 %v2633_v57 }
 0x1b4   : > { %1660 = vmatpush.bf16.xpose.msra.mxu1 %v1598_v34  ;;  %1675 = vmatpush.bf16.xpose.msra.mxu2 %v1574_v24  ;;  %v1542_v34 = vsel %vm1478_vm4, %v1537_v12, %v1541_v56  ;;  %v1502_v43 = vshll.u32 %v2093_v41, 16  ;;  %v1500_v24 = vshrl.u32 %v2093_v41, 16 }
 0x1b5   : > { %v1092_v19 = vor.u32 %v1091_v52, %v1088_v50  ;;  %v1062_v6 = vpack.c.b16 %v1059_v9, %v1059_v9 }
 0x1b6   : > { %1647 = vmatpush.bf16.xpose.msra.mxu0 %v1582_v8 }
 0x1b7   : > { %v1101_v38 = vsel %vm1067_vm3, %v1092_v19, %v2588_v15  ;;  %v1986_v15 = vld [vmem:[%s2725_s6 + $0xc] sm:$0xff] }
 0x1b8   : > { %v1285_v22 = vunpack.c.h.b16 %v1986_v15 }
 0x1ba   : > { %v1288_v57 = vpack.c.b16 %v1285_v22, %v1285_v22 }
 0x1bb   : > { %1233 = vmatpush.bf16.xpose.msrb.mxu3 %v2564_v60  ;;  %v1566_v60 = vsel %vm1478_vm4, %v1561_v29, %v1565_v0  ;;  %v1527_v0 = vshrl.u32 %v2087_v58, 16  ;;  %v2085_v29 = vld [vmem:[#allocation2 + $0xc] sm:$0xff] }
 0x1bc   : > { %1661 = vmatpush.bf16.xpose.msra.mxu1 %v1582_v8  ;;  %v2086_v8 = vld [vmem:[#allocation2 + $0x14] sm:$0xff]  ;;  %1314 = vmatmul.bf16.vlgmr.msrb.gmra.mxu2 %v1288_v57  ;;  %v1487_v35 = vshll.u32 %v2085_v29, 16  ;;  %v1491_v40 = vshrl.u32 %v2085_v29, 16 }
 0x1bd   : > { %v1529_v37 = vor.u32 %v1527_v0, %v1517_v4  ;;  %v1495_v16 = vshll.u32 %v2086_v8, 16  ;;  %v1511_v17 = vshrl.u32 %v2086_v8, 16 }
 0x1be   : > { %1648 = vmatpush.bf16.xpose.msra.mxu0 %v1566_v60 }
 0x1bf   : > { %v1497_v32 = vrot.slane %v1495_v16, 1 }
 0x1c1   : > { %v1513_v23 = vor.u32 %v1511_v17, %v1497_v32  ;;  %v948_v17 = vlaneseq }
 0x1c3   : > { %1234 = vmatpush.bf16.xpose.msrb.mxu3 %v2581_v10  ;;  %v1553_v10 = vor.u32 %v1551_v33, %v1541_v56  ;;  %v1518_v26 = vsel %vm1478_vm4, %v1513_v23, %v1517_v4 }
 0x1c4   : > { %1662 = vmatpush.bf16.xpose.msra.mxu1 %v1566_v60  ;;  %v1284_v60 = vunpack.c.l.b16 %v1986_v15  ;;  %v949_v15 = vand.u32 127, %v948_v17 }
 0x1c5   : > { %v1558_v61 = vsel %vm1478_vm4, %v1553_v10, %v1557_v39  ;;  %v1489_v39 = vrot.slane %v1487_v35, 1 }
 0x1c6   : > { %1649 = vmatpush.bf16.xpose.msra.mxu0 %v1550_v53  ;;  %1676 = vmatpush.bf16.xpose.msra.mxu2 %v1558_v61  ;;  %v1287_v13 = vpack.c.b16 %v1284_v60, %v1284_v60  ;;  %v1690_v61 = vld [vmem:[%s2425_s15] sm:$0xf]  ;;  %v954_v18 = vand.u32 15, %v949_v15 }
 0x1c7   : > { %v1493_v42 = vor.u32 %v1491_v40, %v1489_v39  ;;  %1693 = vperm.xlu0 %2275, %v1690_v61  }
 0x1c8   : > { %1301 = vmatmul.bf16.vlgmr.msrb.gmra.mxu1 %v1287_v13  ;;  %vm962_vm5 = vcmp.ne.s32.totalorder %v954_v18, 0  ;;  %vm963_vm6 = vcmp.ne.s32.totalorder %v954_v18, 15 }
 0x1c9   : > { %v1498_v45 = vsel %vm1478_vm4, %v1493_v42, %v1497_v32 }
 0x1cb   : > { %1235 = vmatpush.bf16.xpose.msrb.mxu3 %v2600_v21  ;;  %v1534_v21 = vsel %vm1478_vm4, %v1529_v37, %v1533_v11  ;;  %v1504_v11 = vrot.slane %v1502_v43, 1 }
 0x1cc   : > { %1663 = vmatpush.bf16.xpose.msra.mxu1 %v1550_v53  ;;  %v2057_v53 = vld [vmem:[%s2725_s6 + $0x20] sm:$0xf] }
 0x1cd   : > { %v1505_v46 = vor.u32 %v1504_v11, %v1500_v24  ;;  %v1471_v33 = vunpack.c.l.b16 %v2057_v53 }
 0x1ce   : > { %1650 = vmatpush.bf16.xpose.msra.mxu0 %v1534_v21  ;;  %1677 = vmatpush.bf16.xpose.msra.mxu2 %v1542_v34 }
 0x1cf   : > { %v1510_v48 = vsel %vm1478_vm4, %v1505_v46, %v1509_v27  ;;  %v1474_v58 = vpack.c.b16 %v1471_v33, %v1471_v33 }
 0x1d3   : > { %1236 = vmatpush.bf16.xpose.msrb.mxu3 %v1101_v38 }
 0x1d4   : > { %1664 = vmatpush.bf16.xpose.msra.mxu1 %v1534_v21 }
 0x1d6   : > { %1651 = vmatpush.bf16.xpose.msra.mxu0 %v1518_v26  ;;  %1678 = vmatpush.bf16.xpose.msra.mxu2 %v1526_v36 }
 0x1da   : > { %1237 = vmatmul.bf16.vlgmr.msrb.gmra.mxu3 %v1062_v6 }
 0x1db   : > { %1319 = vmatpush.bf16.xpose.msra.mxu3 %v1277_v63 }
 0x1dc   : > { %1665 = vmatpush.bf16.xpose.msra.mxu1 %v1518_v26  ;;  %v1689_v26 = vld [vmem:[%s2435_s22] sm:$0xf] }
 0x1de   : > { %1652 = vmatpush.bf16.xpose.msra.mxu0 %v1498_v45  ;;  %1679 = vmatpush.bf16.xpose.msra.mxu2 %v1510_v48 }
 0x1e3   : > { %1320 = vmatpush.bf16.xpose.msra.mxu3 %v2555_v47  ;;  %v1482_v47 = vshll.u32 %v2084_v54, 16 }
 0x1e4   : > { %1666 = vmatpush.bf16.xpose.msra.mxu1 %v1498_v45 }
 0x1e5   : > { %v1484_v50 = vrot.slane %v1482_v47, 1  ;;  %1680 = vmatmul.bf16.vlgmr.msra.gmra.mxu2 %v1474_v58 }
 0x1e7   : > { %v1485_v52 = vor.u32 %v1484_v50, %v1480_v49 }
 0x1e9   : > { %v1490_v56 = vsel %vm1478_vm4, %v1485_v52, %v1489_v39 }
 0x1ea   : > { %1653 = vmatpush.bf16.xpose.msra.mxu0 %v1490_v56 }
 0x1eb   : > { %1321 = vmatpush.bf16.xpose.msra.mxu3 %v2558_v55  ;;  %v2056_v55 = vld [vmem:[%s2725_s6 + $0x18] sm:$0xff] }
 0x1ec   : > { %v1469_v10 = vunpack.c.l.b16 %v2056_v55  ;;  %v1470_v59 = vunpack.c.h.b16 %v2056_v55 }
 0x1ee   : > { %v1472_v14 = vpack.c.b16 %v1469_v10, %v1469_v10  ;;  %v1473_v19 = vpack.c.b16 %v1470_v59, %v1470_v59 }
 0x1f0   : > { %1667 = vmatmul.bf16.vlgmr.msra.gmra.mxu1 %v1473_v19 }
 0x1f1   : > { %1654 = vmatmul.bf16.vlgmr.msra.gmra.mxu0 %v1472_v14 }
 0x1f3   : > { %1322 = vmatpush.bf16.xpose.msra.mxu3 %v2574_v5  ;;  %v1987_v5 = vld [vmem:[%s2725_s6 + $0x14] sm:$0xf] }
 0x1f4   : > { %v1286_v4 = vunpack.c.l.b16 %v1987_v5 }
 0x1f6   : > { %v1289_v0 = vpack.c.b16 %v1286_v4, %v1286_v4 }
 0x1fb   : > { %1323 = vmatpush.bf16.xpose.msra.mxu3 %v2593_v20 }
 0x203   : > { %1324 = vmatpush.bf16.xpose.msra.mxu3 %v2607_v31 }
 0x20b   : > { %1325 = vmatpush.bf16.xpose.msra.mxu3 %v2614_v44 }
 0x213   : > { %1326 = vmatpush.bf16.xpose.msra.mxu3 %v2624_v51  ;;  %v968_v22 = vpop.permute.xlu0 %967 }
 0x214   : > { %v1701_v39 = vpop.permute.xlu1 %1700 }
 0x21a   : > { %1327 = vmatmul.bf16.vlgmr.msra.gmra.mxu3 %v1289_v0 }
 0x21d   : > { %v1225_v1 = vpop.f32.mrf.mxu3 }
 0x225   : > { %v1227_v37 = vpop.f32.mrf.mxu3 }
 0x22a   : > { %v1251_v2 = vpop.f32.mrf.mxu0 }
 0x232   : > { %v1253_v63 = vpop.f32.mrf.mxu0 }
 0x239   : > { %v1694_v27 = vpop.permute.xlu0 %1693 }
 0x23a   : > { %v1696_v36 = vsub.f32 %v1689_v26, %v1694_v27 }
 0x23c   : > { %v1703_v41 = vmul.f32 %v1701_v39, %v1696_v36 }
 0x23f   : > { %v1315_v20 = vpop.f32.mrf.mxu2 }
 0x245   : > { %v1302_v21 = vpop.f32.mrf.mxu1 }
 0x246   : > { %v1316_v57 = vadd.f32 %v1315_v20, %v1302_v21 }
 0x247   : > { %v1317_v7 = vpop.f32.mrf.mxu2 }
 0x24d   : > { %v1304_v44 = vpop.f32.mrf.mxu1 }
 0x25d   : > { %v1238_v38 = vpop.f32.mrf.mxu3 }
 0x25e   : > { %v1239_v3 = vadd.f32 %v1238_v38, %v1225_v1 }
 0x260   : > { %v1252_v31 = vadd.f32 %v1251_v2, %v1239_v3 }
 0x262   : > { %v1257_v23 = vsel %vm962_vm5, %v1252_v31, 0.0 }
 0x263   : > { %v1258_v29 = vadd.f32 %v1257_v23, %v968_v22 }
 0x265   : > { %v1240_v8 = vpop.f32.mrf.mxu3 }
 0x268   : > { %v1681_v16 = vpop.f32.mrf.mxu2 }
 0x26d   : > { %v1668_v12 = vpop.f32.mrf.mxu1 }
 0x26e   : > { %v1655_v9 = vpop.f32.mrf.mxu0 }
 0x26f   : > { %v1669_v6 = vadd.f32 %v1668_v12, %v1655_v9 }
 0x270   : > { %v1683_v32 = vpop.f32.mrf.mxu2 }
 0x271   : > { %v1682_v25 = vadd.f32 %v1681_v16, %v1669_v6 }
 0x273   : > { %v1687_v35 = vsel %vm963_vm6, %v1682_v25, 0.0 }
 0x275   : > { %v1670_v51 = vpop.f32.mrf.mxu1 }
 0x276   : > { %v1657_v34 = vpop.f32.mrf.mxu0 }
 0x29d   : > { %v1328_v28 = vpop.f32.mrf.mxu3 }
 0x29e   : > { %v1329_v30 = vadd.f32 %v1328_v28, %v1316_v57 }
 0x2a0   : > { %v1332_v60 = vadd.f32 %v1329_v30, %v1258_v29 }
 0x2a2   : > { %v1688_v40 = vadd.f32 %v1687_v35, %v1332_v60 }
 0x2a4   : > { %v1704_v13 = vadd.f32 1.0, %v1688_v40  ;;  %v1707_v45 = vrot.slane %v1688_v40, 4 }
 0x2a5   : > { %v1330_v42 = vpop.f32.mrf.mxu3 }
 0x2a6   : > { %v1705_v43 = vmul.f32 %v1704_v13, %v1703_v41 }
 0x2a8   : > { %v1709_v24 = vadd.f32 %v1707_v45, %v1705_v43 }
 0x2aa   : > { %1710 = vst [vmem:[%s2440_s13] sm:$0xf] %v1709_v24 }
 0x2ab PF: > { %s18_s9 = sadd.s32 1, %s2315_s9   ;;  %s2734_s15 = sld [smem:[#allocation3_spill]] }
 0x2ac   : > { %p15_p9 = scmp.ge.s32.totalorder %s18_s9, 6   ;;  %s2735_s19 = sld [smem:[#allocation4_spill]] }
 0x2ad   : > { %s2736_s27 = smov %s2307_s29  ;;  %s2737_s28 = smov %s2311_s30 }
 0x2ae   :  { %17 = sbr.rel (!%p15_p9) target bundleno = 4 (0x4), region = 103 }
 0x2b1   : > { %s2738_s29 = smov %s2734_s15 }
 0x2b2   : > { %s2739_s30 = smov %s2735_s19 }

</bundles_post_ra>
